<compile_context>
chip_gen: v7x
topology: tpu7x:2x2x1
jax: 0.10.0
libtpu: 0.0.40
codegen_flags: <defaults>
</compile_context>

<pallas_src>
import functools
import math

import jax
import jax.numpy as jnp
from jax.experimental import pallas as pl
from jax.experimental.pallas import tpu as pltpu


def _round_up(n, m):
    return ((n + m - 1) // m) * m


def _choose_row_tile(n_rows, feat, hidden, max_tile=256,
                     vmem_budget=40 * 1024 * 1024):
    """Pick a row tile: fixed 256 rows when possible, >=2 grid steps, 16-row aligned,
    shrunk if the VMEM footprint (resident weights + double-buffered tiles + f32 hidden)
    would blow the budget at real Hiera widths."""
    if n_rows >= 2 * max_tile:
        tm = max_tile
    else:
        # small inputs: still aim for 2 grid steps so both v7x TensorCores get work
        tm = max(16, _round_up(pl.cdiv(n_rows, 2), 16))

    def footprint(t):
        weights = 2 * (feat * hidden + hidden * feat) * 2          # bf16, double-buffered
        biases = 2 * (hidden + feat) * 4                           # f32
        acts = 2 * (t * feat * 2) + 2 * (t * feat * 4)             # x (bf16) + out (f32), db
        hid = t * hidden * 4                                       # f32 hidden intermediate
        return weights + biases + acts + hid

    while tm > 64 and footprint(tm) > vmem_budget:
        tm //= 2
    return max(16, (tm // 16) * 16)


# ------------------------------ Pallas kernel -----------------------------------

def _mlp_gelu_kernel(x_ref, w1_ref, b1_ref, w2_ref, b2_ref, o_ref, *, approximate_gelu):
    # fc1: bf16 activations & weights on the MXU, f32 accumulation
    h = jnp.dot(x_ref[...], w1_ref[...],
                preferred_element_type=jnp.float32) + b1_ref[...]
    if approximate_gelu:
        # tanh-approx GELU -> EUP slot (opt-in; not bit-matching nn.GELU())
        h = jax.nn.gelu(h, approximate=True)
    else:
        # exact (erf) GELU in f32, matching torch.nn.GELU()
        h = 0.5 * h * (1.0 + jax.lax.erf(h * (1.0 / math.sqrt(2.0))))
    # fc2
    y = jnp.dot(h.astype(jnp.bfloat16), w2_ref[...],
                preferred_element_type=jnp.float32) + b2_ref[...]
    o_ref[...] = y.astype(o_ref.dtype)


# ------------------------------- wrapper -----------------------------------------

def mlp2layers_gelu(x, params, *, approximate_gelu=False):
    """x: (..., F) -> (..., F) via one fused Pallas kernel."""
    orig_shape = x.shape
    F = orig_shape[-1]
    H = params["w1"].shape[1]

    # flatten leading dims, cast activations to bf16 (halves the dominant HBM stream)
    x2 = x.reshape(-1, F).astype(jnp.bfloat16)
    n = x2.shape[0]

    tm = _choose_row_tile(n, F, H)
    n_rows = _round_up(n, tm)
    if n_rows != n:
        x2 = jnp.pad(x2, ((0, n_rows - n), (0, 0)))

    # bf16 weights (cast once at trace time): halves weight DMA, feeds the bf16 MXU path
    w1 = params["w1"].astype(jnp.bfloat16)
    w2 = params["w2"].astype(jnp.bfloat16)
    b1 = params["b1"].reshape(1, H).astype(jnp.float32)
    b2 = params["b2"].reshape(1, F).astype(jnp.float32)

    kernel = functools.partial(_mlp_gelu_kernel, approximate_gelu=approximate_gelu)

    out = pl.pallas_call(
        kernel,
        out_shape=jax.ShapeDtypeStruct((n_rows, F), x.dtype),
        grid=(n_rows // tm,),
        in_specs=[pl.BlockSpec((tm, F), lambda i: (i, 0)),   # activations (bf16, row-tiled)
                  pl.BlockSpec((F, H), lambda i: (0, 0)),    # W1 resident in VMEM
                  pl.BlockSpec((1, H), lambda i: (0, 0)),    # b1
                  pl.BlockSpec((H, F), lambda i: (0, 0)),    # W2 resident in VMEM
                  pl.BlockSpec((1, F), lambda i: (0, 0))],   # b2
        out_specs=pl.BlockSpec((tm, F), lambda i: (i, 0)),   # lane-dense (F multiple of 128)
        compiler_params=pltpu.CompilerParams(
            dimension_semantics=("parallel",),               # megacore split of the row axis
            vmem_limit_bytes=48 * 1024 * 1024),              # headroom under v7x's 64 MiB
    )(x2, w1, b1, w2, b2)

    if n_rows != n:
        out = out[:n]
    return out.reshape(orig_shape)


# ------------------------------- params & reference ------------------------------

def init_params(key, num_features, hidden_features_ratio=4.0):
    hidden = int(round(hidden_features_ratio * num_features))
    k1, k2, k3, k4 = jax.random.split(key, 4)
    return dict(
        w1=(jax.random.normal(k1, (num_features, hidden), jnp.float32)
            / math.sqrt(num_features)),
        b1=0.01 * jax.random.normal(k2, (hidden,), jnp.float32),
        w2=(jax.random.normal(k3, (hidden, num_features), jnp.float32)
            / math.sqrt(hidden)),
        b2=0.01 * jax.random.normal(k4, (num_features,), jnp.float32),
    )


def reference_forward(x, params):
    """Pure-JAX f32 reference mirroring nn.Linear -> nn.GELU() -> nn.Linear."""
    h = x @ params["w1"] + params["b1"]
    h = jax.nn.gelu(h, approximate=False)
    return h @ params["w2"] + params["b2"]


# --------------------------------- main -------------------------------------------

if __name__ == "__main__":
    key = jax.random.PRNGKey(0)
    kx, kp = jax.random.split(key)

    # Tokens from a Hiera block: batch=2, 16x16 spatial tokens, 128 features/token,
    # hidden_features_ratio=4.0 -> hidden=512.  n_rows = 512 -> tm=256, grid=(2,).
    B, Ht, Wt, F = 2, 16, 16, 128
    x = jax.random.normal(kx, (B, Ht, Wt, F), jnp.float32)
    params = init_params(kp, F, hidden_features_ratio=4.0)

    out = mlp2layers_gelu(x, params)
    out = jax.block_until_ready(out)
    assert out.shape == x.shape, out.shape

    with jax.default_matmul_precision("highest"):
        ref = jax.block_until_ready(reference_forward(x, params))

    assert bool(jnp.all(jnp.isfinite(out)))
    max_err = float(jnp.max(jnp.abs(out - ref)))
    assert bool(jnp.allclose(out, ref, atol=3e-2, rtol=3e-2)), max_err

    print("KERNEL_OK")
</pallas_src>

<mosaic_0001>
module attributes {stable_mosaic.version = 11 : i64} {
  func.func @_mlp_gelu_kernel(%arg0: i32, %arg1: memref<256x128xbf16, #tpu.memory_space<vmem>>, %arg2: memref<128x512xbf16, #tpu.memory_space<vmem>>, %arg3: memref<1x512xf32, #tpu.memory_space<vmem>>, %arg4: memref<512x128xbf16, #tpu.memory_space<vmem>>, %arg5: memref<1x128xf32, #tpu.memory_space<vmem>>, %arg6: memref<256x128xf32, #tpu.memory_space<vmem>>) attributes {dimension_semantics = [#tpu.dimension_semantics<parallel>], iteration_bounds = array<i64: 2>, scalar_prefetch = 0 : i64, scratch_operands = 0 : i64, tpu.core_type = #tpu.core_type<tc>, window_params = [{transform_indices = @transform_0, window_bounds = array<i64: 256, 128>}, {pipeline_mode = #tpu.pipeline_mode<synchronous>, transform_indices = @transform_1, window_bounds = array<i64: 128, 512>}, {pipeline_mode = #tpu.pipeline_mode<synchronous>, transform_indices = @transform_2, window_bounds = array<i64: 1, 512>}, {pipeline_mode = #tpu.pipeline_mode<synchronous>, transform_indices = @transform_3, window_bounds = array<i64: 512, 128>}, {pipeline_mode = #tpu.pipeline_mode<synchronous>, transform_indices = @transform_4, window_bounds = array<i64: 1, 128>}, {transform_indices = @transform_5, window_bounds = array<i64: 256, 128>}]} {
    %c0 = arith.constant 0 : index
    %c0_0 = arith.constant 0 : index
    %0 = vector.load %arg1[%c0, %c0_0] : memref<256x128xbf16, #tpu.memory_space<vmem>>, vector<256x128xbf16>
    %c0_1 = arith.constant 0 : index
    %c0_2 = arith.constant 0 : index
    %1 = vector.load %arg2[%c0_1, %c0_2] : memref<128x512xbf16, #tpu.memory_space<vmem>>, vector<128x512xbf16>
    %cst = arith.constant dense<0.000000e+00> : vector<256x512xf32>
    %2 = tpu.matmul %0, %1, %cst {dimension_numbers = #tpu.dot_dimension_numbers<[1], [0], [0], [1], [0, 0, 1, 1], [], []>} : vector<256x128xbf16>, vector<128x512xbf16>, vector<256x512xf32> -> vector<256x512xf32>
    %c0_3 = arith.constant 0 : index
    %c0_4 = arith.constant 0 : index
    %3 = vector.load %arg3[%c0_3, %c0_4] : memref<1x512xf32, #tpu.memory_space<vmem>>, vector<1x512xf32>
    %4 = vector.broadcast %3 : vector<1x512xf32> to vector<256x512xf32>
    %5 = arith.addf %2, %4 : vector<256x512xf32>
    %cst_5 = arith.constant 5.000000e-01 : f32
    %6 = vector.broadcast %cst_5 : f32 to vector<256x512xf32>
    %7 = arith.mulf %6, %5 : vector<256x512xf32>
    %cst_6 = arith.constant 0.707106769 : f32
    %8 = vector.broadcast %cst_6 : f32 to vector<256x512xf32>
    %9 = arith.mulf %5, %8 : vector<256x512xf32>
    %10 = math.erf %9 : vector<256x512xf32>
    %cst_7 = arith.constant 1.000000e+00 : f32
    %11 = vector.broadcast %cst_7 : f32 to vector<256x512xf32>
    %12 = arith.addf %11, %10 : vector<256x512xf32>
    %13 = arith.mulf %7, %12 : vector<256x512xf32>
    %14 = arith.truncf %13 : vector<256x512xf32> to vector<256x512xbf16>
    %c0_8 = arith.constant 0 : index
    %c0_9 = arith.constant 0 : index
    %15 = vector.load %arg4[%c0_8, %c0_9] : memref<512x128xbf16, #tpu.memory_space<vmem>>, vector<512x128xbf16>
    %cst_10 = arith.constant dense<0.000000e+00> : vector<256x128xf32>
    %16 = tpu.matmul %14, %15, %cst_10 {dimension_numbers = #tpu.dot_dimension_numbers<[1], [0], [0], [1], [0, 0, 1, 1], [], []>} : vector<256x512xbf16>, vector<512x128xbf16>, vector<256x128xf32> -> vector<256x128xf32>
    %c0_11 = arith.constant 0 : index
    %c0_12 = arith.constant 0 : index
    %17 = vector.load %arg5[%c0_11, %c0_12] : memref<1x128xf32, #tpu.memory_space<vmem>>, vector<1x128xf32>
    %18 = vector.broadcast %17 : vector<1x128xf32> to vector<256x128xf32>
    %19 = arith.addf %16, %18 : vector<256x128xf32>
    %c0_13 = arith.constant 0 : index
    %c0_14 = arith.constant 0 : index
    %20 = vector.load %arg6[%c0_13, %c0_14] : memref<256x128xf32, #tpu.memory_space<vmem>>, vector<256x128xf32>
    tpu.vector_store %arg6[%c0_13, %c0_14], %19 {strides = array<i32>} : memref<256x128xf32, #tpu.memory_space<vmem>>, vector<256x128xf32>,
    return
  }
  func.func @transform_0(%arg0: i32) -> (i32, i32) {
    %c0_i32 = arith.constant 0 : i32
    %c0_i32_0 = arith.constant 0 : i32
    return %arg0, %c0_i32 : i32, i32
  }
  func.func @transform_1(%arg0: i32) -> (i32, i32) {
    %c0_i32 = arith.constant 0 : i32
    %c0_i32_0 = arith.constant 0 : i32
    %c0_i32_1 = arith.constant 0 : i32
    return %c0_i32, %c0_i32_0 : i32, i32
  }
  func.func @transform_2(%arg0: i32) -> (i32, i32) {
    %c0_i32 = arith.constant 0 : i32
    %c0_i32_0 = arith.constant 0 : i32
    %c0_i32_1 = arith.constant 0 : i32
    return %c0_i32, %c0_i32_0 : i32, i32
  }
  func.func @transform_3(%arg0: i32) -> (i32, i32) {
    %c0_i32 = arith.constant 0 : i32
    %c0_i32_0 = arith.constant 0 : i32
    %c0_i32_1 = arith.constant 0 : i32
    return %c0_i32, %c0_i32_0 : i32, i32
  }
  func.func @transform_4(%arg0: i32) -> (i32, i32) {
    %c0_i32 = arith.constant 0 : i32
    %c0_i32_0 = arith.constant 0 : i32
    %c0_i32_1 = arith.constant 0 : i32
    return %c0_i32, %c0_i32_0 : i32, i32
  }
  func.func @transform_5(%arg0: i32) -> (i32, i32) {
    %c0_i32 = arith.constant 0 : i32
    %c0_i32_0 = arith.constant 0 : i32
    return %arg0, %c0_i32 : i32, i32
  }
}

</mosaic_0001>

<bundles_post_ra>
// kernel: tpu_custom_call.1
= control target key start
LH: loop header
LB: loop body
LE: loop exit
PB: predicated region body
PF: predicated region fallthrough
CT: control target
= control target key end

     0   :  { %10 = vsyncpa [#allocation3], 0  ;;  %s4864_s0 = inlined_call_operand.hbm [shape: bf16[512,128], index: 0, kind: input, shape index: {}]   ;;  %s4865_s1 = inlined_call_operand.hbm [shape: bf16[128,512], index: 1, kind: input, shape index: {}]   ;;  %s4866_s2 = inlined_call_operand.vmem [shape: f32[1,512], index: 2, kind: input, shape index: {}]   ;;  %s4867_s3 = inlined_call_operand.hbm [shape: bf16[512,128], index: 3, kind: input, shape index: {}]   ;;  %s4868_s4 = inlined_call_operand.vmem [shape: f32[1,128], index: 4, kind: input, shape index: {}]   ;;  %s4869_s5 = inlined_call_operand.hbm [shape: f32[512,128], index: 5, kind: output, shape index: {}]  }
   0x1   :  { %12 = vsyncpa [#allocation3 + $0x1], 0 }
   0x2   :  { %13 = vsyncpa [#allocation6], 0 }
   0x3   :  { %14 = vsyncpa [#allocation4], 0 }
   0x4   :  { %16 = vsyncpa [#allocation4 + $0x1], 0  ;;  %s3380_s18 = smov 0   ;;  %s3382_s19 = smov 0  }
   0x5   :  { %s3384_s20 = smov 0   ;;  %s3386_s21 = smov 0  }
   0x6 LB: > { %s3401_s22 = sadd.s32 4294967295, %s3337_s21   ;;  %s2430_s23 = sadd.s32 4294967294, %s3337_s21   ;;  %s3337_s21 = sphi %s3386_s21, %s4977_s21   ;;  %s3333_s20 = sphi %s3384_s20, %s4976_s20   ;;  %s3329_s19 = sphi %s3382_s19, %s4975_s19   ;;  %s3325_s18 = sphi %s3380_s18, %s4974_s18  }
   0x7   : > { %p42_p0 = scmp.ne.s32.totalorder %s3329_s19, %s3325_s18  ;;  %p4870_p1 = scmp.eq.s32.totalorder %s3401_s22, 0 }
   0x8   : > { %p156_p3 = scmp.eq.s32.totalorder %s2430_s23, 1  ;;  %p2431_p5 = scmp.ge.s32.totalorder %s3337_s21, 1 }
   0x9   : > { %p3410_p4 = por %p4870_p1, %p42_p0  ;;  %p163_p7 = scmp.lt.s32.totalorder %s3337_s21, 3 }
   0xa   : > { %p3415_p6 = por %p156_p3, %p42_p0  ;;  %s3339_s27 = smov [#allocation5]  }
   0xb   : > { %s4873_s24 = scalar_select %p3410_p4, 1, 0 }
   0xc   : > { %s4874_s25 = scalar_select %p3415_p6, 1, 0 }
   0xd   : > { %p3420_p8 = pnand %p2431_p5, %p163_p7  ;;  %s175_s28 = sshll.u32 %s3339_s27, 4  ;;  %s3424_s28 = int_to_ptr.vmem [resolvable:$true] %s175_s28 }
   0xe   : > { %s3340_s30 = smov [#allocation7]   ;;  %s3181_s9 = scalar_lea.hbm %s4865_s1, 4096 }
   0xf   : > { %p2767_p9 = pneg %p3420_p8  ;;  %s191_s6 = sshll.u32 %s3340_s30, 4  ;;  %s3435_s6 = int_to_ptr.vmem [resolvable:$true] %s191_s6 }
  0x10   : > { %p3182_p12 = scmp.ne.s32.totalorder %s4865_s1, %s3181_s9  ;;  %p3188_p5 = scmp.lt.u32.totalorder %s3181_s9, %s4865_s1 }
  0x11   : > { %p3431_p11 = pnand %p2767_p9, %p4870_p1 }
  0x13   : > { %p3183_p13 = pneg %p3431_p11 }
  0x15   : > { %p3184_p0 = pnand %p3183_p13, %p3182_p12 }
  0x17   : > { %p3185_p3 = pneg %p3184_p0 }
  0x19   : > { %p3190_p7 = pnand %p3188_p5, %p3185_p3 }
  0x1b   : > { %3193 = shalt.err (!%p3190_p7)
}
  0x1c   : > { %s3194_s14 = scalar_lea.vmem %s3424_s28, 4096  ;;  %p3202_p2 = scmp.lt.s32.totalorder %s3424_s28, %s3424_s28 }
  0x1d   : > { %p3195_p9 = scmp.ne.s32.totalorder %s3424_s28, %s3194_s14  ;;  %p3203_p12 = scmp.lt.s32.totalorder %s3194_s14, %s3194_s14 }
  0x1f   : > { %p3197_p10 = pnand %p3195_p9, %p3183_p13  ;;  %p3204_p0 = por %p3203_p12, %p3202_p2 }
  0x21   : > { %p3198_p1 = pneg %p3197_p10 }
  0x23   : > { %p3205_p6 = pnand %p3204_p0, %p3198_p1 }
  0x25   : > { %3208 = shalt.err (!%p3205_p6)
}
  0x26   : > { %s3341_s15 = smov 256   ;;  %s3342_s16 = smov 16  }
  0x27   : > { %2770 = dma.hbm_to_vmem [thread:$0]  (!%p3431_p11), %s4865_s1, 4096, %s3424_s28, [#allocation6], %s3341_s15, %s3341_s15, %s3342_s16  }
  0x28   : > { %s3209_s7 = scalar_lea.hbm %s4867_s3, 4096 }
  0x29   : > { %p3210_p2 = scmp.ne.s32.totalorder %s4867_s3, %s3209_s7  ;;  %p3216_p10 = scmp.lt.u32.totalorder %s3209_s7, %s4867_s3 }
  0x2b   : > { %p3212_p1 = pnand %p3210_p2, %p3183_p13 }
  0x2d   : > { %p3213_p6 = pneg %p3212_p1 }
  0x2f   : > { %p3218_p3 = pnand %p3216_p10, %p3213_p6 }
  0x31   : > { %3221 = shalt.err (!%p3218_p3)
}
  0x32   : > { %s3222_s28 = scalar_lea.vmem %s3435_s6, 4096  ;;  %p3230_p12 = scmp.lt.s32.totalorder %s3435_s6, %s3435_s6 }
  0x33   : > { %p3223_p5 = scmp.ne.s32.totalorder %s3435_s6, %s3222_s28  ;;  %p3231_p0 = scmp.lt.s32.totalorder %s3222_s28, %s3222_s28 }
  0x35   : > { %p3225_p7 = pnand %p3223_p5, %p3183_p13  ;;  %p3232_p2 = por %p3231_p0, %p3230_p12 }
  0x37   : > { %p3226_p9 = pneg %p3225_p7 }
  0x39   : > { %p3233_p1 = pnand %p3232_p2, %p3226_p9 }
  0x3b   : > { %3236 = shalt.err (!%p3233_p1)
}
  0x3c   : > { %s3343_s12 = smov 64   ;;  %s3344_s13 = smov 4  }
  0x3d   : > { %2773 = dma.hbm_to_vmem [thread:$0]  (!%p3431_p11), %s4867_s3, 4096, %s3435_s6, [#allocation6], %s3343_s12, %s3343_s12, %s3344_s13  }
  0x3e   : > { %s3493_s16 = sadd.s32 1, %s3337_s21   ;;  %s29_s23 = sadd.s32 1, %s3333_s20 }
  0x3f   : > { %s26_s17 = ssub.s32 %s3337_s21, %s3493_s16  ;;  %p36_p6 = scmp.ne.s32.totalorder %s3333_s20, %s3329_s19 }
  0x40   : > { %p27_p13 = scmp.eq.s32.totalorder %s26_s17, 0  ;;  %p37_p10 = scmp.eq.s32.totalorder %s3337_s21, 0 }
  0x41   : > { %p4877_p5 = scmp.eq.s32.totalorder %s3401_s22, 1  ;;  %p2784_p9 = scmp.lt.s32.totalorder %s3337_s21, 2 }
  0x42   : > { %s3502_s27 = scalar_select %p27_p13, %s3333_s20, %s29_s23  }
  0x43   : > { %p38_p3 = por %p37_p10, %p36_p6  ;;  %p3506_p7 = por %p4877_p5, %p36_p6 }
  0x44   : > { %s208_s30 = sand.u32 1, %s3333_s20   ;;  %s2529_s6 = sshll.u32 %s3337_s21, 11 }
  0x45   : > { %s4878_s29 = scalar_select %p3506_p7, 1, 0 }
  0x46   : > { %s2435_s7 = sshll.u32 %s208_s30, 7  ;;  %s3516_s10 = scalar_lea.hbm %s4864_s0, %s2529_s6 }
  0x47   : > { %s212_s11 = scalar_lea.vmem [#allocation2], %s2435_s7  ;;  %p3520_p11 = pnand %p2784_p9, %p38_p3 }
  0x48   : > { %s219_s28 = sshll.u32 %s212_s11, 4  ;;  %s3524_s15 = scalar_lea.sflag [#allocation3], %s208_s30  ;;  %s3518_s28 = int_to_ptr.vmem [resolvable:$true] %s219_s28 }
  0x49   : > { %s3237_s17 = scalar_lea.hbm %s3516_s10, 2048  ;;  %p3239_p0 = pneg %p3520_p11 }
  0x4a   : > { %p3238_p12 = scmp.ne.s32.totalorder %s3516_s10, %s3237_s17  ;;  %s3242_s6 = scalar_lea.hbm %s4864_s0, 4096 }
  0x4b   : > { %p3243_p13 = scmp.lt.u32.totalorder %s3516_s10, %s4864_s0  ;;  %p3244_p6 = scmp.lt.u32.totalorder %s3242_s6, %s3237_s17 }
  0x4c   : > { %p3240_p2 = pnand %p3239_p0, %p3238_p12  ;;  %p3246_p3 = scmp.lt.u32.totalorder %s3237_s17, %s3516_s10 }
  0x4d   : > { %p3245_p10 = por %p3244_p6, %p3243_p13 }
  0x4e   : > { %p3241_p1 = pneg %p3240_p2 }
  0x4f   : > { %p3247_p5 = por %p3246_p3, %p3245_p10 }
  0x51   : > { %p3248_p9 = pnand %p3247_p5, %p3241_p1 }
  0x53   : > { %3251 = shalt.err (!%p3248_p9)
}
  0x54   : > { %s3252_s30 = scalar_lea.vmem %s3518_s28, 2048  ;;  %s3345_s11 = smov [#allocation2]  }
  0x55   : > { %p3253_p12 = scmp.ne.s32.totalorder %s3518_s28, %s3252_s30  ;;  %s3257_s23 = sshll.u32 %s3345_s11, 4  ;;  %s3258_s23 = int_to_ptr.vmem [resolvable:$false] %s3257_s23 }
  0x56   : > { %s3259_s7 = scalar_lea.vmem %s3258_s23, 4096  ;;  %p3260_p4 = scmp.lt.s32.totalorder %s3518_s28, %s3258_s23 }
  0x57   : > { %p3255_p2 = pnand %p3253_p12, %p3239_p0  ;;  %p3261_p13 = scmp.lt.s32.totalorder %s3259_s7, %s3252_s30 }
  0x59   : > { %p3256_p7 = pneg %p3255_p2  ;;  %p3262_p6 = por %p3261_p13, %p3260_p4 }
  0x5b   : > { %p3263_p10 = pnand %p3262_p6, %p3256_p7 }
  0x5d   : > { %3266 = shalt.err (!%p3263_p10)
}
  0x5e   : > { %2777 = dma.hbm_to_vmem [thread:$0]  (!%p3520_p11), %s3516_s10, 2048, %s3518_s28, %s3524_s15, %s3343_s12, %s3343_s12, %s3344_s13  }
  0x5f   : > { %231 = sbr.rel (%p3420_p8) target bundleno = 811 (0x32b), region = 40 }
  0x66   : > { %s3558_s17 = sand.u32 1, %s3329_s19   ;;  %p4880_p4 = scmp.ne.s32.totalorder %s4873_s24, 0 }
  0x67   : > { %s2439_s6 = sshll.u32 %s3558_s17, 7  ;;  %s234_s8 = scalar_lea.sflag [#allocation3], %s3558_s17 }
  0x68   : > { %s3562_s9 = scalar_lea.vmem [#allocation2], %s2439_s6 }
  0x69   : > { %3312 = dma.done.wait (%p4880_p4), %s234_s8, 2048  }
  0x6a   : > { %3314 = vsyncadd (%p4880_p4), %s234_s8, 4294965248  ;;  %p4881_p7 = scmp.eq.s32.totalorder %s3401_s22, 0 }
  0x6c   : > { %3316 = dma.done.wait (%p4881_p7), [#allocation6], 8192   ;;  %p4882_p8 = pmov %p4881_p7 }
  0x6d   : > { %v3346_v0 = vmov 0   ;;  %v2829_v1 = vld [vmem:[#allocation5 + $0x4] ss:$16 sps:$4 sm:$0xff]   ;;  %v2831_v2 = vld [vmem:[#allocation5 + $0xc] ss:$16 sps:$4 sm:$0xff]   ;;  %s2442_s10 = sshll.u32 %s3558_s17, 8 }
  0x6e   : > { %3318 = vsyncadd (%p4882_p8), [#allocation6], 4294959104  ;;  %649 = vmatprep.mubr.bf16.mxu0 %v3346_v0  ;;  %842 = vmatprep.mubr.bf16.mxu1 %v3346_v0  ;;  %v2833_v3 = vld [vmem:[#allocation5] ss:$16 sps:$4 sm:$0xff]   ;;  %v2834_v4 = vld [vmem:[#allocation5 + $0x8] ss:$16 sps:$4 sm:$0xff]  }
  0x6f   : > { %617 = vmatprep.subr.bf16.mxu0 %v2829_v1  ;;  %810 = vmatprep.subr.bf16.mxu1 %v2831_v2  ;;  %v2835_v5 = vld [vmem:[#allocation5 + $0x24] ss:$16 sps:$4 sm:$0xff]   ;;  %v2837_v6 = vld [vmem:[#allocation5 + $0x2c] ss:$16 sps:$4 sm:$0xff]   ;;  %v2839_v7 = vld [vmem:[#allocation5 + $0x20] ss:$16 sps:$4 sm:$0xff]  }
  0x70   : > { %618 = vmatpush1.bf16.msra.mxu0 %v2833_v3  ;;  %811 = vmatpush1.bf16.msra.mxu1 %v2834_v4  ;;  %v2840_v8 = vld [vmem:[#allocation5 + $0x28] ss:$16 sps:$4 sm:$0xff]   ;;  %v2841_v9 = vld [vmem:[#allocation5 + $0x44] ss:$16 sps:$4 sm:$0xff]   ;;  %v2843_v10 = vld [vmem:[#allocation5 + $0x4c] ss:$16 sps:$4 sm:$0xff]  }
  0x71   : > { %619 = vmatprep.subr.bf16.mxu0 %v2835_v5  ;;  %812 = vmatprep.subr.bf16.mxu1 %v2837_v6  ;;  %v2845_v11 = vld [vmem:[#allocation5 + $0x40] ss:$16 sps:$4 sm:$0xff]   ;;  %v2846_v12 = vld [vmem:[#allocation5 + $0x48] ss:$16 sps:$4 sm:$0xff]   ;;  %v2847_v13 = vld [vmem:[#allocation5 + $0x64] ss:$16 sps:$4 sm:$0xff]  }
  0x72   : > { %v2849_v14 = vld [vmem:[#allocation5 + $0x6c] ss:$16 sps:$4 sm:$0xff]   ;;  %v2851_v15 = vld [vmem:[#allocation5 + $0x60] ss:$16 sps:$4 sm:$0xff]   ;;  %v2852_v16 = vld [vmem:[#allocation5 + $0x68] ss:$16 sps:$4 sm:$0xff]  }
  0x73   : > { %v2853_v17 = vld [vmem:[#allocation5 + $0x84] ss:$16 sps:$4 sm:$0xff]   ;;  %v2855_v18 = vld [vmem:[#allocation5 + $0x8c] ss:$16 sps:$4 sm:$0xff]   ;;  %v2857_v19 = vld [vmem:[#allocation5 + $0x80] ss:$16 sps:$4 sm:$0xff]  }
  0x74   : > { %620 = vmatpush1.bf16.msra.mxu0 %v2839_v7  ;;  %813 = vmatpush1.bf16.msra.mxu1 %v2840_v8  ;;  %v2858_v20 = vld [vmem:[#allocation5 + $0x88] ss:$16 sps:$4 sm:$0xff]   ;;  %v2859_v21 = vld [vmem:[#allocation5 + $0xa4] ss:$16 sps:$4 sm:$0xff]   ;;  %v2861_v22 = vld [vmem:[#allocation5 + $0xac] ss:$16 sps:$4 sm:$0xff]  }
  0x75   : > { %621 = vmatprep.subr.bf16.mxu0 %v2841_v9  ;;  %814 = vmatprep.subr.bf16.mxu1 %v2843_v10  ;;  %v2863_v23 = vld [vmem:[#allocation5 + $0xa0] ss:$16 sps:$4 sm:$0xff]   ;;  %v2864_v24 = vld [vmem:[#allocation5 + $0xa8] ss:$16 sps:$4 sm:$0xff]   ;;  %v2865_v25 = vld [vmem:[#allocation5 + $0xc4] ss:$16 sps:$4 sm:$0xff]  }
  0x76   : > { %v2867_v26 = vld [vmem:[#allocation5 + $0xcc] ss:$16 sps:$4 sm:$0xff]   ;;  %v2869_v27 = vld [vmem:[#allocation5 + $0xc0] ss:$16 sps:$4 sm:$0xff]   ;;  %v2870_v28 = vld [vmem:[#allocation5 + $0xc8] ss:$16 sps:$4 sm:$0xff]  }
  0x77   : > { %v2871_v29 = vld [vmem:[#allocation5 + $0xe4] ss:$16 sps:$4 sm:$0xff]   ;;  %v2873_v30 = vld [vmem:[#allocation5 + $0xec] ss:$16 sps:$4 sm:$0xff]   ;;  %v2875_v31 = vld [vmem:[#allocation5 + $0xe0] ss:$16 sps:$4 sm:$0xff]  }
  0x78   : > { %622 = vmatpush1.bf16.msra.mxu0 %v2845_v11  ;;  %815 = vmatpush1.bf16.msra.mxu1 %v2846_v12  ;;  %v2876_v32 = vld [vmem:[#allocation5 + $0xe8] ss:$16 sps:$4 sm:$0xff]   ;;  %v2877_v33 = vld [vmem:[%s3562_s9] sm:$0xff]   ;;  %v2879_v42 = vld [vmem:[%s3562_s9 + $0x10] sm:$0xff]   ;;  %s4749_s28 = scalar_lea.vmem [#allocation8], %s2442_s10  ;;  %s2530_s14 = sshll.u32 %s3401_s22, 12 }
  0x79   : > { %623 = vmatprep.subr.bf16.mxu0 %v2847_v13  ;;  %816 = vmatprep.subr.bf16.mxu1 %v2849_v14  ;;  %v2891_v34 = vld [vmem:[#allocation7 + $0x40] sm:$0xff]   ;;  %v2878_v35 = vld [vmem:[%s3562_s9 + $0x8] sm:$0xff]   ;;  %v2901_v44 = vld [vmem:[#allocation7 + $0x50] sm:$0xff]   ;;  %s2338_s15 = sshll.u32 %s4749_s28, 4  ;;  %s4816_s23 = scalar_lea.hbm %s4869_s5, %s2530_s14  ;;  %s4818_s15 = int_to_ptr.vmem [resolvable:$true] %s2338_s15 }
  0x7a   : > { %v2892_v36 = vld [vmem:[#allocation7] sm:$0xff]   ;;  %v2897_v39 = vld [vmem:[#allocation7 + $0x48] sm:$0xff]   ;;  %v2902_v45 = vld [vmem:[#allocation7 + $0x10] sm:$0xff]   ;;  %s2325_s22 = scalar_lea.sflag [#allocation4], %s3558_s17  ;;  %s3267_s7 = scalar_lea.vmem %s4818_s15, 4096 }
  0x7b   : > { %v2893_v37 = vld [vmem:[#allocation7 + $0xc0] sm:$0xff]   ;;  %v2898_v40 = vld [vmem:[#allocation7 + $0x8] sm:$0xff]   ;;  %v2903_v46 = vld [vmem:[#allocation7 + $0xd0] sm:$0xff]   ;;  %p3268_p11 = scmp.ne.s32.totalorder %s4818_s15, %s3267_s7  ;;  %p4971_p0 = scmp.ne.s32.totalorder %s4878_s29, 0 }
  0x7c   : > { %624 = vmatpush1.bf16.msra.mxu0 %v2851_v15  ;;  %817 = vmatpush1.bf16.msra.mxu1 %v2852_v16  ;;  %v2894_v38 = vld [vmem:[#allocation7 + $0x80] sm:$0xff]   ;;  %v2899_v41 = vld [vmem:[#allocation7 + $0xc8] sm:$0xff]   ;;  %v2904_v47 = vld [vmem:[#allocation7 + $0x90] sm:$0xff]   ;;  %s3347_s6 = smov [#allocation8]  }
  0x7d   : > { %625 = vmatprep.subr.bf16.mxu0 %v2853_v17  ;;  %818 = vmatprep.subr.bf16.mxu1 %v2855_v18  ;;  %v2900_v43 = vld [vmem:[#allocation7 + $0x88] sm:$0xff]   ;;  %v2905_v48 = vld [vmem:[#allocation7 + $0x58] sm:$0xff]   ;;  %v2909_v53 = vld [vmem:[#allocation7 + $0x60] sm:$0xff]   ;;  %v341_v18 = vlaneseq  ;;  %p3269_p1 = pnand %p3268_p11, %p4971_p0  ;;  %s3271_s8 = sshll.u32 %s3347_s6, 4  ;;  %s3272_s8 = int_to_ptr.vmem [resolvable:$false] %s3271_s8 }
  0x7e   : > { %v2906_v49 = vld [vmem:[#allocation7 + $0x18] sm:$0xff]   ;;  %v2910_v54 = vld [vmem:[#allocation7 + $0x20] sm:$0xff]   ;;  %v2913_v57 = vld [vmem:[#allocation7 + $0x68] sm:$0xff]   ;;  %p3274_p5 = scmp.lt.s32.totalorder %s4818_s15, %s3272_s8 }
  0x7f   : > { %v2907_v50 = vld [vmem:[#allocation7 + $0xd8] sm:$0xff]   ;;  %v2911_v55 = vld [vmem:[#allocation7 + $0xe0] sm:$0xff]   ;;  %v2914_v58 = vld [vmem:[#allocation7 + $0x28] sm:$0xff]   ;;  %p3270_p3 = pneg %p3269_p1 }
  0x80   : > { %626 = vmatpush1.bf16.msra.mxu0 %v2857_v19  ;;  %819 = vmatpush1.bf16.msra.mxu1 %v2858_v20  ;;  %v2880_v51 = vld [vmem:[%s3562_s9 + $0x18] sm:$0xff]   ;;  %v2912_v56 = vld [vmem:[#allocation7 + $0xa0] sm:$0xff]   ;;  %v2915_v59 = vld [vmem:[#allocation7 + $0xe8] sm:$0xff]   ;;  %v342_v19 = vshrl.u32 %v341_v18, 7 }
  0x81   : > { %627 = vmatprep.subr.bf16.mxu0 %v2859_v21  ;;  %820 = vmatprep.subr.bf16.mxu1 %v2861_v22  ;;  %v2908_v52 = vld [vmem:[#allocation7 + $0x98] sm:$0xff]   ;;  %v2881_v60 = vld [vmem:[%s3562_s9 + $0x20] sm:$0xff]   ;;  %v2916_v61 = vld [vmem:[#allocation7 + $0xa8] sm:$0xff]  }
  0x82   : > { %v2917_v62 = vld [vmem:[#allocation7 + $0x70] sm:$0xff]   ;;  %v2882_v3 = vld [vmem:[%s3562_s9 + $0x28] sm:$0xff]   ;;  %v2884_v5 = vld [vmem:[%s3562_s9 + $0x38] sm:$0xff]   ;;  %v343_v20 = vsub.s32 0, %v342_v19  ;;  %v351_v21 = vsub.s32 2, %v342_v19 }
  0x83   : > { %v2918_v63 = vld [vmem:[#allocation7 + $0x30] sm:$0xff]   ;;  %v2885_v6 = vld [vmem:[%s3562_s9 + $0x40] sm:$0xff]   ;;  %v2886_v7 = vld [vmem:[%s3562_s9 + $0x48] sm:$0xff]  }
  0x84   : > { %628 = vmatpush1.bf16.msra.mxu0 %v2863_v23  ;;  %821 = vmatpush1.bf16.msra.mxu1 %v2864_v24  ;;  %v2919_v1 = vld [vmem:[#allocation7 + $0xf0] sm:$0xff]   ;;  %v2888_v9 = vld [vmem:[%s3562_s9 + $0x58] sm:$0xff]   ;;  %v2889_v10 = vld [vmem:[%s3562_s9 + $0x60] sm:$0xff]   ;;  %v347_v23 = vsub.s32 1, %v342_v19  ;;  %v355_v24 = vsub.s32 3, %v342_v19 }
  0x85   : > { %629 = vmatprep.subr.bf16.mxu0 %v2865_v25  ;;  %822 = vmatprep.subr.bf16.mxu1 %v2867_v26  ;;  %v2920_v2 = vld [vmem:[#allocation7 + $0xb0] sm:$0xff]   ;;  %v2890_v11 = vld [vmem:[%s3562_s9 + $0x68] sm:$0xff]   ;;  %v2921_v12 = vld [vmem:[#allocation7 + $0x78] sm:$0xff]  }
  0x86   : > { %v2883_v4 = vld [vmem:[%s3562_s9 + $0x30] sm:$0xff]   ;;  %v2922_v14 = vld [vmem:[#allocation7 + $0x38] sm:$0xff]   ;;  %v339_v22 = vld [vmem:[%s4866_s2] sm:$0xf] }
  0x87   : > { %v2887_v8 = vld [vmem:[%s3562_s9 + $0x50] sm:$0xff]   ;;  %v2923_v15 = vld [vmem:[#allocation7 + $0xf8] sm:$0xff]   ;;  %v3623_v25 = vrot.slane %v339_v22, %v343_v20  ;;  %v3625_v26 = vrot.slane %v339_v22, %v351_v21 }
  0x88   : > { %630 = vmatpush1.bf16.msra.mxu0 %v2869_v27  ;;  %823 = vmatpush1.bf16.msra.mxu1 %v2870_v28  ;;  %v2895_v13 = vld [vmem:[%s3562_s9 + $0x70] sm:$0xff]   ;;  %v2924_v16 = vld [vmem:[#allocation7 + $0xb8] sm:$0xff]   ;;  %v3627_v27 = vrot.slane %v339_v22, %v347_v23 }
  0x89   : > { %631 = vmatprep.subr.bf16.mxu0 %v2871_v29  ;;  %824 = vmatprep.subr.bf16.mxu1 %v2873_v30  ;;  %v2896_v17 = vld [vmem:[%s3562_s9 + $0x78] sm:$0xff]   ;;  %s3273_s9 = scalar_lea.vmem %s3272_s8, 8192 }
  0x8a   : > { %p3275_p9 = scmp.lt.s32.totalorder %s3273_s9, %s3267_s7 }
  0x8c   : > { %632 = vmatpush1.bf16.msra.mxu0 %v2875_v31  ;;  %825 = vmatpush1.bf16.msra.mxu1 %v2876_v32  ;;  %p3276_p12 = por %p3275_p9, %p3274_p5 }
  0x8d   : > { %2531 = vmatprep.subr.bf16.mxu0 %v2891_v34  ;;  %2643 = vmatprep.subr.bf16.mxu1 %v2893_v37 }
  0x8e   : > { %p3277_p2 = pnand %p3276_p12, %p3270_p3 }
  0x8f   : > { %650 = vmatmul.mubr.bf16.vlgmr.msra.gmra.mrb[0].mxu0 %v2877_v33  ;;  %843 = vmatmul.mubr.bf16.vlgmr.msra.gmra.mrb[0].mxu1 %v2877_v33 }
  0x90   : > { %659 = vmatprep.mubr.bf16.mxu0 %v3346_v0  ;;  %852 = vmatprep.mubr.bf16.mxu1 %v3346_v0 }
  0x91   : > { %2532 = vmatpush3.bf16.msra.mxu0 %v2892_v36  ;;  %2644 = vmatpush3.bf16.msra.mxu1 %v2894_v38 }
  0x92   : > { %2533 = vmatprep.subr.bf16.mxu0 %v2897_v39  ;;  %2645 = vmatprep.subr.bf16.mxu1 %v2899_v41 }
  0x95   : > { %2534 = vmatpush3.bf16.msra.mxu0 %v2898_v40  ;;  %2646 = vmatpush3.bf16.msra.mxu1 %v2900_v43 }
  0x96   : > { %2535 = vmatprep.subr.bf16.mxu0 %v2901_v44  ;;  %2647 = vmatprep.subr.bf16.mxu1 %v2903_v46 }
  0x97   : > { %660 = vmatmul.mubr.bf16.gmra.mrb[4].mxu0 %v2878_v35  ;;  %853 = vmatmul.mubr.bf16.gmra.mrb[4].mxu1 %v2878_v35 }
  0x98   : > { %669 = vmatprep.mubr.bf16.mxu0 %v3346_v0  ;;  %862 = vmatprep.mubr.bf16.mxu1 %v3346_v0 }
  0x99   : > { %2536 = vmatpush3.bf16.msra.mxu0 %v2902_v45  ;;  %2648 = vmatpush3.bf16.msra.mxu1 %v2904_v47 }
  0x9a   : > { %2537 = vmatprep.subr.bf16.mxu0 %v2905_v48  ;;  %2649 = vmatprep.subr.bf16.mxu1 %v2907_v50 }
  0x9d   : > { %2538 = vmatpush3.bf16.msra.mxu0 %v2906_v49  ;;  %2650 = vmatpush3.bf16.msra.mxu1 %v2908_v52 }
  0x9e   : > { %2539 = vmatprep.subr.bf16.mxu0 %v2909_v53  ;;  %2651 = vmatprep.subr.bf16.mxu1 %v2911_v55 }
  0x9f   : > { %670 = vmatmul.mubr.bf16.gmra.mrb[8].mxu0 %v2879_v42  ;;  %863 = vmatmul.mubr.bf16.gmra.mrb[8].mxu1 %v2879_v42 }
  0xa0   : > { %679 = vmatprep.mubr.bf16.mxu0 %v3346_v0  ;;  %872 = vmatprep.mubr.bf16.mxu1 %v3346_v0 }
  0xa1   : > { %2540 = vmatpush3.bf16.msra.mxu0 %v2910_v54  ;;  %2652 = vmatpush3.bf16.msra.mxu1 %v2912_v56 }
  0xa2   : > { %2541 = vmatprep.subr.bf16.mxu0 %v2913_v57  ;;  %2653 = vmatprep.subr.bf16.mxu1 %v2915_v59 }
  0xa5   : > { %2542 = vmatpush3.bf16.msra.mxu0 %v2914_v58  ;;  %2654 = vmatpush3.bf16.msra.mxu1 %v2916_v61 }
  0xa6   : > { %2543 = vmatprep.subr.bf16.mxu0 %v2917_v62  ;;  %2655 = vmatprep.subr.bf16.mxu1 %v2919_v1 }
  0xa7   : > { %680 = vmatmul.mubr.bf16.gmra.mrb[12].mxu0 %v2880_v51  ;;  %873 = vmatmul.mubr.bf16.gmra.mrb[12].mxu1 %v2880_v51 }
  0xa8   : > { %689 = vmatprep.mubr.bf16.mxu0 %v3346_v0  ;;  %882 = vmatprep.mubr.bf16.mxu1 %v3346_v0 }
  0xa9   : > { %2544 = vmatpush3.bf16.msra.mxu0 %v2918_v63  ;;  %2656 = vmatpush3.bf16.msra.mxu1 %v2920_v2 }
  0xaa   : > { %2545 = vmatprep.subr.bf16.mxu0 %v2921_v12  ;;  %2657 = vmatprep.subr.bf16.mxu1 %v2923_v15 }
  0xad   : > { %2546 = vmatpush3.bf16.msra.mxu0 %v2922_v14  ;;  %2658 = vmatpush3.bf16.msra.mxu1 %v2924_v16 }
  0xaf   : > { %690 = vmatmul.mubr.bf16.gmra.mrb[16].mxu0 %v2881_v60  ;;  %883 = vmatmul.mubr.bf16.gmra.mrb[16].mxu1 %v2881_v60 }
  0xb0   : > { %699 = vmatprep.mubr.bf16.mxu0 %v3346_v0  ;;  %892 = vmatprep.mubr.bf16.mxu1 %v3346_v0 }
  0xb7   : > { %700 = vmatmul.mubr.bf16.gmra.mrb[20].mxu0 %v2882_v3  ;;  %893 = vmatmul.mubr.bf16.gmra.mrb[20].mxu1 %v2882_v3 }
  0xb8   : > { %709 = vmatprep.mubr.bf16.mxu0 %v3346_v0  ;;  %902 = vmatprep.mubr.bf16.mxu1 %v3346_v0 }
  0xbf   : > { %710 = vmatmul.mubr.bf16.gmra.mrb[24].mxu0 %v2883_v4  ;;  %903 = vmatmul.mubr.bf16.gmra.mrb[24].mxu1 %v2883_v4 }
  0xc0   : > { %719 = vmatprep.mubr.bf16.mxu0 %v3346_v0  ;;  %912 = vmatprep.mubr.bf16.mxu1 %v3346_v0 }
  0xc7   : > { %720 = vmatmul.mubr.bf16.gmra.mrb[28].mxu0 %v2884_v5  ;;  %913 = vmatmul.mubr.bf16.gmra.mrb[28].mxu1 %v2884_v5 }
  0xc8   : > { %729 = vmatprep.mubr.bf16.mxu0 %v3346_v0  ;;  %922 = vmatprep.mubr.bf16.mxu1 %v3346_v0 }
  0xcf   : > { %730 = vmatmul.mubr.bf16.gmra.mrb[32].mxu0 %v2885_v6  ;;  %923 = vmatmul.mubr.bf16.gmra.mrb[32].mxu1 %v2885_v6 }
  0xd0   : > { %739 = vmatprep.mubr.bf16.mxu0 %v3346_v0  ;;  %932 = vmatprep.mubr.bf16.mxu1 %v3346_v0 }
  0xd7   : > { %740 = vmatmul.mubr.bf16.gmra.mrb[36].mxu0 %v2886_v7  ;;  %933 = vmatmul.mubr.bf16.gmra.mrb[36].mxu1 %v2886_v7 }
  0xd8   : > { %749 = vmatprep.mubr.bf16.mxu0 %v3346_v0  ;;  %942 = vmatprep.mubr.bf16.mxu1 %v3346_v0 }
  0xdf   : > { %750 = vmatmul.mubr.bf16.gmra.mrb[40].mxu0 %v2887_v8  ;;  %943 = vmatmul.mubr.bf16.gmra.mrb[40].mxu1 %v2887_v8 }
  0xe0   : > { %759 = vmatprep.mubr.bf16.mxu0 %v3346_v0  ;;  %952 = vmatprep.mubr.bf16.mxu1 %v3346_v0 }
  0xe7   : > { %760 = vmatmul.mubr.bf16.gmra.mrb[44].mxu0 %v2888_v9  ;;  %953 = vmatmul.mubr.bf16.gmra.mrb[44].mxu1 %v2888_v9 }
  0xe8   : > { %769 = vmatprep.mubr.bf16.mxu0 %v3346_v0  ;;  %962 = vmatprep.mubr.bf16.mxu1 %v3346_v0 }
  0xef   : > { %770 = vmatmul.mubr.bf16.gmra.mrb[48].mxu0 %v2889_v10  ;;  %963 = vmatmul.mubr.bf16.gmra.mrb[48].mxu1 %v2889_v10 }
  0xf0   : > { %779 = vmatprep.mubr.bf16.mxu0 %v3346_v0  ;;  %972 = vmatprep.mubr.bf16.mxu1 %v3346_v0 }
  0xf7   : > { %780 = vmatmul.mubr.bf16.gmra.mrb[52].mxu0 %v2890_v11  ;;  %973 = vmatmul.mubr.bf16.gmra.mrb[52].mxu1 %v2890_v11 }
  0xf8   : > { %789 = vmatprep.mubr.bf16.mxu0 %v3346_v0  ;;  %982 = vmatprep.mubr.bf16.mxu1 %v3346_v0 }
  0xff   : > { %790 = vmatmul.mubr.bf16.gmra.mrb[56].mxu0 %v2895_v13  ;;  %983 = vmatmul.mubr.bf16.gmra.mrb[56].mxu1 %v2895_v13 }
 0x100   : > { %799 = vmatprep.mubr.bf16.mxu0 %v3346_v0  ;;  %992 = vmatprep.mubr.bf16.mxu1 %v3346_v0  ;;  %v3629_v0 = vrot.slane %v339_v22, %v355_v24 }
 0x107   : > { %800 = vmatmul.mubr.bf16.gmra.mrb[60].mxu0 %v2896_v17  ;;  %993 = vmatmul.mubr.bf16.gmra.mrb[60].mxu1 %v2896_v17 }
 0x162   : > { %v651_v28 = vpop.f32.mrb[0].mxu0  ;;  %v844_v29 = vpop.f32.mrb[0].mxu1 }
 0x163   : > { %v652_v30 = vadd.f32 %v651_v28, %v3623_v25  ;;  %v845_v31 = vadd.f32 %v844_v29, %v3625_v26  ;;  %v653_v32 = vpop.f32.mrb[1].mxu0  ;;  %v846_v33 = vpop.f32.mrb[1].mxu1 }
 0x164   : > { %v654_v34 = vadd.f32 %v653_v32, %v3627_v27  ;;  %v847_v35 = vadd.f32 %v846_v33, %v3629_v0  ;;  %v655_v36 = vpop.f32.mrb[2].mxu0  ;;  %v848_v37 = vpop.f32.mrb[2].mxu1 }
 0x165   : > { %v1131_v38 = vmul.f32 0.70710677, %v652_v30  ;;  %v1133_v39 = vmul.f32 0.70710677, %v845_v31  ;;  %v656_v42 = vadd.f32 %v655_v36, %v3623_v25  ;;  %v849_v43 = vadd.f32 %v848_v37, %v3625_v26  ;;  %v657_v44 = vpop.f32.mrb[3].mxu0  ;;  %v850_v45 = vpop.f32.mrb[3].mxu1 }
 0x166   : > { %v1132_v40 = vmul.f32 0.70710677, %v654_v34  ;;  %v1134_v41 = vmul.f32 0.70710677, %v847_v35  ;;  %v658_v46 = vadd.f32 %v657_v44, %v3627_v27  ;;  %v851_v47 = vadd.f32 %v850_v45, %v3629_v0 }
 0x167   : > { %2925 = verf.f32 %v1131_v38  ;;  %v1135_v48 = vmul.f32 0.70710677, %v656_v42  ;;  %v1137_v49 = vmul.f32 0.70710677, %v849_v43  ;;  %v1003_v3 = vmul.f32 0.5, %v652_v30 }
 0x168   : > { %2927 = verf.f32 %v1133_v39  ;;  %v1136_v50 = vmul.f32 0.70710677, %v658_v46  ;;  %v1138_v52 = vmul.f32 0.70710677, %v851_v47  ;;  %v1005_v10 = vmul.f32 0.5, %v845_v31 }
 0x169   : > { %2929 = verf.f32 %v1132_v40  ;;  %v1004_v11 = vmul.f32 0.5, %v654_v34  ;;  %v3646_v12 = vmul.f32 0.5, %v847_v35  ;;  %v1007_v13 = vmul.f32 0.5, %v656_v42 }
 0x16a   : > { %2931 = verf.f32 %v1134_v41  ;;  %v661_v51 = vpop.f32.mrb[4].mxu0  ;;  %v854_v54 = vpop.f32.mrb[4].mxu1  ;;  %v1009_v16 = vmul.f32 0.5, %v849_v43  ;;  %v3648_v21 = vmul.f32 0.5, %v658_v46  ;;  %v3650_v22 = vmul.f32 0.5, %v851_v47 }
 0x16b   : > { %2933 = verf.f32 %v1135_v48  ;;  %v662_v53 = vadd.f32 %v661_v51, %v3623_v25  ;;  %v663_v55 = vpop.f32.mrb[5].mxu0  ;;  %v855_v56 = vadd.f32 %v854_v54, %v3625_v26  ;;  %v856_v58 = vpop.f32.mrb[5].mxu1 }
 0x16c   : > { %2935 = verf.f32 %v1137_v49  ;;  %v664_v57 = vadd.f32 %v663_v55, %v3627_v27  ;;  %v665_v59 = vpop.f32.mrb[6].mxu0  ;;  %v857_v61 = vadd.f32 %v856_v58, %v3629_v0  ;;  %v858_v62 = vpop.f32.mrb[6].mxu1 }
 0x16d   : > { %2937 = verf.f32 %v1136_v50  ;;  %v1139_v60 = vmul.f32 0.70710677, %v662_v53  ;;  %v667_v63 = vpop.f32.mrb[7].mxu0  ;;  %v1141_v1 = vmul.f32 0.70710677, %v855_v56  ;;  %v860_v2 = vpop.f32.mrb[7].mxu1  ;;  %v666_v6 = vadd.f32 %v665_v59, %v3623_v25 }
 0x16e   : > { %2939 = verf.f32 %v1138_v52  ;;  %v1140_v4 = vmul.f32 0.70710677, %v664_v57  ;;  %v1142_v5 = vmul.f32 0.70710677, %v857_v61  ;;  %v859_v7 = vadd.f32 %v858_v62, %v3625_v26 }
 0x16f   : > { %2941 = verf.f32 %v1139_v60  ;;  %v668_v8 = vadd.f32 %v667_v63, %v3627_v27  ;;  %v1143_v17 = vmul.f32 0.70710677, %v666_v6  ;;  %v861_v24 = vadd.f32 %v860_v2, %v3629_v0 }
 0x170   : > { %2943 = verf.f32 %v1141_v1  ;;  %v1145_v23 = vmul.f32 0.70710677, %v859_v7  ;;  %v3653_v31 = vmul.f32 0.5, %v662_v53  ;;  %v3655_v36 = vmul.f32 0.5, %v855_v56 }
 0x171   : > { %v2926_v9 = vpop.eup %2925  ;;  %2945 = verf.f32 %v1140_v4  ;;  %v1144_v32 = vmul.f32 0.70710677, %v668_v8  ;;  %v3657_v37 = vmul.f32 0.5, %v664_v57  ;;  %v3659_v38 = vmul.f32 0.5, %v857_v61 }
 0x172   : > { %v2928_v14 = vpop.eup %2927  ;;  %v1387_v15 = vadd.f32 1.0, %v2926_v9  ;;  %v671_v18 = vpop.f32.mrb[8].mxu0  ;;  %2947 = verf.f32 %v1142_v5  ;;  %v3665_v45 = vmul.f32 0.5, %v666_v6  ;;  %v1146_v49 = vmul.f32 0.70710677, %v861_v24 }
 0x173   : > { %v864_v19 = vpop.f32.mrb[8].mxu1  ;;  %v2930_v20 = vpop.eup %2929  ;;  %v1389_v30 = vadd.f32 1.0, %v2928_v14  ;;  %2949 = verf.f32 %v1143_v17  ;;  %v672_v50 = vadd.f32 %v671_v18, %v3623_v25  ;;  %v3680_v62 = vmul.f32 0.5, %v859_v7 }
 0x174   : > { %v673_v28 = vpop.f32.mrb[9].mxu0  ;;  %v2932_v29 = vpop.eup %2931  ;;  %v3663_v42 = vmul.f32 %v1387_v15, %v1003_v3  ;;  %v1388_v43 = vadd.f32 1.0, %v2930_v20  ;;  %2951 = verf.f32 %v1145_v23  ;;  %v865_v54 = vadd.f32 %v864_v19, %v3625_v26 }
 0x175   : > { %v866_v33 = vpop.f32.mrb[9].mxu1  ;;  %v675_v34 = vpop.f32.mrb[10].mxu0  ;;  %v3670_v52 = vmul.f32 %v1389_v30, %v1005_v10  ;;  %2953 = verf.f32 %v1144_v32  ;;  %v1390_v56 = vadd.f32 1.0, %v2932_v29  ;;  %v1147_v58 = vmul.f32 0.70710677, %v672_v50 }
 0x176   : > { %v2934_v35 = vpop.eup %2933  ;;  %v868_v39 = vpop.f32.mrb[10].mxu1  ;;  %v674_v59 = vadd.f32 %v673_v28, %v3627_v27  ;;  %v3682_v63 = vmul.f32 0.5, %v668_v8  ;;  %v3684_v1 = vmul.f32 0.5, %v861_v24  ;;  %v3688_v4 = vmul.f32 %v1388_v43, %v1004_v11 }
 0x177   : > { %v3661_v40 = vpop.f32.mrb[11].mxu0  ;;  %v2936_v41 = vpop.eup %2935  ;;  %v1391_v44 = vadd.f32 1.0, %v2934_v35  ;;  %2955 = verf.f32 %v1146_v49  ;;  %v1149_v14 = vmul.f32 0.70710677, %v865_v54  ;;  %v3701_v11 = vmul.f32 %v1390_v56, %v3646_v12 }
 0x178   : > { %v3667_v46 = vpop.f32.mrb[11].mxu1  ;;  %v2938_v47 = vpop.eup %2937  ;;  %v1393_v48 = vadd.f32 1.0, %v2936_v41  ;;  %2957 = verf.f32 %v1147_v58  ;;  %v1148_v18 = vmul.f32 0.70710677, %v674_v59  ;;  %v867_v19 = vadd.f32 %v866_v33, %v3629_v0 }
 0x179   : > { %v2940_v51 = vpop.eup %2939  ;;  %v3672_v53 = vmul.f32 %v1391_v44, %v1007_v13  ;;  %v1392_v6 = vadd.f32 1.0, %v2938_v47  ;;  %v3708_v28 = vmul.f32 0.5, %v672_v50  ;;  %2959 = verf.f32 %v1149_v14 }
 0x17a   : > { %v2942_v55 = vpop.eup %2941  ;;  %v3675_v57 = vmul.f32 %v1393_v48, %v1009_v16  ;;  %v681_v2 = vpop.f32.mrb[12].mxu0  ;;  %v1394_v13 = vadd.f32 1.0, %v2940_v51  ;;  %v676_v29 = vadd.f32 %v675_v34, %v3623_v25  ;;  %v869_v30 = vadd.f32 %v868_v39, %v3625_v26 }
 0x17b   : > { %v2944_v60 = vpop.eup %2943  ;;  %v1643_v61 = vpack.c.bf16 %v3672_v53, %v3663_v42  ;;  %v3686_v3 = vpop.f32.mrb[12].mxu1  ;;  %v1395_v8 = vadd.f32 1.0, %v2942_v55  ;;  %v1520_v12 = vmul.f32 %v1392_v6, %v3648_v21  ;;  %v3713_v41 = vmul.f32 0.5, %v865_v54 }
 0x17c   : > { %v1645_v5 = vpack.c.bf16 %v3675_v57, %v3670_v52  ;;  %v3692_v9 = vpop.f32.mrb[13].mxu0  ;;  %v3694_v10 = vpop.f32.mrb[13].mxu1  ;;  %v1397_v17 = vadd.f32 1.0, %v2944_v60  ;;  %2961 = verf.f32 %v1148_v18  ;;  %v1522_v33 = vmul.f32 %v1394_v13, %v3650_v22 }
 0x17d   : > { %v2946_v7 = vpop.eup %2945  ;;  %v3696_v15 = vpop.f32.mrb[14].mxu0  ;;  %v3717_v43 = vmul.f32 %v1395_v8, %v3653_v31  ;;  %v1150_v44 = vmul.f32 0.70710677, %v867_v19  ;;  %v1151_v47 = vmul.f32 0.70710677, %v676_v29  ;;  %v3722_v39 = vmul.f32 0.5, %v674_v59 }
 0x17e   : > { %v3698_v16 = vpop.f32.mrb[14].mxu1  ;;  %v3704_v20 = vpop.f32.mrb[15].mxu0  ;;  %v1396_v35 = vadd.f32 1.0, %v2946_v7  ;;  %v3720_v49 = vmul.f32 %v1397_v17, %v3655_v36  ;;  %v1153_v50 = vmul.f32 0.70710677, %v869_v30  ;;  %v678_v54 = vadd.f32 %v3661_v40, %v3627_v27 }
 0x17f   : > { %v3706_v23 = vpop.f32.mrb[15].mxu1  ;;  %v2948_v24 = vpop.eup %2947  ;;  %2963 = verf.f32 %v1150_v44  ;;  %v871_v22 = vadd.f32 %v3667_v46, %v3629_v0  ;;  %v3735_v56 = vmul.f32 0.5, %v867_v19  ;;  %v682_v58 = vadd.f32 %v681_v2, %v3623_v25 }
 0x180   : > { %v2950_v32 = vpop.eup %2949  ;;  %v1398_v34 = vadd.f32 1.0, %v2948_v24  ;;  %v3733_v36 = vmul.f32 %v1396_v35, %v3657_v37  ;;  %2965 = verf.f32 %v1151_v47  ;;  %v3742_v6 = vmul.f32 0.5, %v676_v29 }
 0x181   : > { %v2952_v48 = vpop.eup %2951  ;;  %v1399_v51 = vadd.f32 1.0, %v2950_v32  ;;  %2967 = verf.f32 %v1153_v50  ;;  %v1152_v46 = vmul.f32 0.70710677, %v678_v54  ;;  %v1154_v17 = vmul.f32 0.70710677, %v871_v22 }
 0x182   : > { %v2954_v21 = vpop.eup %2953  ;;  %v3728_v31 = vpop.f32.mrb[16].mxu0  ;;  %v1401_v40 = vadd.f32 1.0, %v2952_v48  ;;  %v3749_v8 = vmul.f32 %v1398_v34, %v3659_v38  ;;  %v1155_v2 = vmul.f32 0.70710677, %v682_v58  ;;  %v875_v29 = vadd.f32 %v3686_v3, %v3625_v26 }
 0x183   : > { %v3730_v55 = vpop.f32.mrb[16].mxu1  ;;  %v3738_v59 = vpop.f32.mrb[17].mxu0  ;;  %v1400_v14 = vadd.f32 1.0, %v2954_v21  ;;  %v3754_v24 = vmul.f32 %v1399_v51, %v3665_v45  ;;  %2969 = verf.f32 %v1152_v46  ;;  %v684_v32 = vadd.f32 %v3692_v9, %v3627_v27 }
 0x184   : > { %v3740_v60 = vpop.f32.mrb[17].mxu1  ;;  %v3744_v7 = vpop.f32.mrb[18].mxu0  ;;  %2971 = verf.f32 %v1154_v17  ;;  %v877_v38 = vadd.f32 %v3694_v10, %v3629_v0  ;;  %v1644_v44 = vpack.c.bf16 %v1520_v12, %v3688_v4  ;;  %v1646_v47 = vpack.c.bf16 %v1522_v33, %v3701_v11 }
 0x185   : > { %v3746_v13 = vpop.f32.mrb[18].mxu1  ;;  %v2956_v37 = vpop.eup %2955  ;;  %v3767_v45 = vmul.f32 %v1401_v40, %v3680_v62  ;;  %v3769_v50 = vmul.f32 0.5, %v869_v30  ;;  %v1157_v3 = vmul.f32 0.70710677, %v875_v29  ;;  %v3772_v9 = vmul.f32 %v1400_v14, %v3682_v63 }
 0x186   : > { %v3751_v18 = vpop.f32.mrb[19].mxu0  ;;  %v2958_v19 = vpop.eup %2957  ;;  %v1402_v34 = vadd.f32 1.0, %v2956_v37  ;;  %2973 = verf.f32 %v1155_v2  ;;  %v1156_v46 = vmul.f32 0.70710677, %v684_v32  ;;  %2002 = vmatprep.mubr.bf16.mxu0 %v1644_v44  ;;  %2163 = vmatprep.mubr.bf16.mxu1 %v1646_v47  ;;  %v3774_v4 = vmul.f32 0.5, %v678_v54 }
 0x187   : > { %v3760_v35 = vpop.f32.mrb[19].mxu1  ;;  %v2960_v48 = vpop.eup %2959  ;;  %v1403_v51 = vadd.f32 1.0, %v2958_v19  ;;  %v3776_v10 = vmul.f32 0.5, %v871_v22  ;;  %v1158_v11 = vmul.f32 0.70710677, %v877_v38  ;;  %v686_v62 = vadd.f32 %v3696_v15, %v3623_v25  ;;  %2003 = vmatmul.mubr.bf16.vlgmr.msra.gmra.mrb[64].mxu0 %v1643_v61  ;;  %2164 = vmatmul.mubr.bf16.vlgmr.msra.gmra.mrb[64].mxu1 %v1645_v5 }
 0x188   : > { %v2962_v21 = vpop.eup %2961  ;;  %v1405_v12 = vadd.f32 1.0, %v2960_v48  ;;  %2975 = verf.f32 %v1157_v3  ;;  %v879_v33 = vadd.f32 %v3698_v16, %v3625_v26  ;;  %v688_v15 = vadd.f32 %v3704_v20, %v3627_v27 }
 0x189   : > { %v2964_v53 = vpop.eup %2963  ;;  %v3799_v52 = vmul.f32 %v1402_v34, %v3684_v1  ;;  %v1404_v57 = vadd.f32 1.0, %v2962_v21  ;;  %2977 = verf.f32 %v1156_v46  ;;  %v1159_v61 = vmul.f32 0.70710677, %v686_v62 }
 0x18a   : > { %v3786_v63 = vpop.f32.mrb[20].mxu0  ;;  %v3788_v30 = vpop.f32.mrb[20].mxu1  ;;  %v3806_v16 = vmul.f32 %v1403_v51, %v3708_v28  ;;  %v3808_v20 = vmul.f32 0.5, %v682_v58  ;;  %2979 = verf.f32 %v1158_v11  ;;  %v1161_v37 = vmul.f32 0.70710677, %v879_v33 }
 0x18b   : > { %v3794_v54 = vpop.f32.mrb[21].mxu0  ;;  %v3796_v42 = vpop.f32.mrb[21].mxu1  ;;  %v3812_v1 = vmul.f32 0.5, %v875_v29  ;;  %v3814_v2 = vmul.f32 0.5, %v684_v32  ;;  %v1160_v19 = vmul.f32 0.70710677, %v688_v15  ;;  %v881_v44 = vadd.f32 %v3706_v23, %v3629_v0 }
 0x18c   : > { %v3801_v5 = vpop.f32.mrb[22].mxu0  ;;  %v3803_v22 = vpop.f32.mrb[22].mxu1  ;;  %v3821_v28 = vmul.f32 %v1405_v12, %v3713_v41  ;;  %v3823_v58 = vmul.f32 0.5, %v877_v38  ;;  %2981 = verf.f32 %v1159_v61  ;;  %v692_v48 = vadd.f32 %v3728_v31, %v3623_v25 }
 0x18d   : > { %v2966_v40 = vpop.eup %2965  ;;  %v3810_v14 = vpop.f32.mrb[23].mxu0  ;;  %v3828_v29 = vmul.f32 %v1404_v57, %v3722_v39  ;;  %v1406_v32 = vadd.f32 1.0, %v2964_v53  ;;  %2983 = verf.f32 %v1161_v37  ;;  %v1162_v3 = vmul.f32 0.70710677, %v881_v44 }
 0x18e   : > { %v2968_v17 = vpop.eup %2967  ;;  %v3818_v47 = vpop.f32.mrb[23].mxu1  ;;  %v1407_v23 = vadd.f32 1.0, %v2966_v40  ;;  %2985 = verf.f32 %v1160_v19  ;;  %v1163_v46 = vmul.f32 0.70710677, %v692_v48  ;;  %v885_v38 = vadd.f32 %v3730_v55, %v3625_v26 }
 0x18f   : > { %v2970_v34 = vpop.eup %2969  ;;  %v1409_v51 = vadd.f32 1.0, %v2968_v17  ;;  %2987 = verf.f32 %v1162_v3  ;;  %v694_v31 = vadd.f32 %v3738_v59, %v3627_v27  ;;  %v3838_v57 = vmul.f32 0.5, %v686_v62 }
 0x190   : > { %v2972_v21 = vpop.eup %2971  ;;  %v1408_v41 = vadd.f32 1.0, %v2970_v34  ;;  %2989 = verf.f32 %v1163_v46  ;;  %v887_v61 = vadd.f32 %v3740_v60, %v3629_v0  ;;  %v3847_v55 = vmul.f32 %v1406_v32, %v3735_v56 }
 0x191   : > { %v2974_v12 = vpop.eup %2973  ;;  %v1410_v53 = vadd.f32 1.0, %v2972_v21  ;;  %v3849_v59 = vmul.f32 0.5, %v879_v33  ;;  %v3851_v17 = vmul.f32 0.5, %v688_v15  ;;  %v1165_v19 = vmul.f32 0.70710677, %v885_v38 }
 0x192   : > { %v3834_v11 = vpop.f32.mrb[24].mxu0  ;;  %v3836_v39 = vpop.f32.mrb[24].mxu1  ;;  %v3858_v21 = vmul.f32 %v1407_v23, %v3742_v6  ;;  %v3861_v60 = vmul.f32 %v1409_v51, %v3769_v50  ;;  %v3863_v46 = vmul.f32 0.5, %v881_v44  ;;  %v3865_v56 = vmul.f32 0.5, %v692_v48 }
 0x193   : > { %v3842_v40 = vpop.f32.mrb[25].mxu0  ;;  %v3844_v37 = vpop.f32.mrb[25].mxu1  ;;  %v1648_v6 = vpack.c.bf16 %v3772_v9, %v3733_v36  ;;  %v3877_v50 = vmul.f32 %v1410_v53, %v3776_v10  ;;  %v3879_v44 = vmul.f32 0.5, %v885_v38  ;;  %v1166_v48 = vmul.f32 0.70710677, %v887_v61 }
 0x194   : > { %4883 = vst [vmem:[#allocation12_spill] sm:$0xff] %v3844_v37  ;;  %v3853_v34 = vpop.f32.mrb[26].mxu0  ;;  %v3855_v62 = vpop.f32.mrb[26].mxu1  ;;  %v1164_v37 = vmul.f32 0.70710677, %v694_v31  ;;  %v1650_v51 = vpack.c.bf16 %v3799_v52, %v3749_v8  ;;  %2991 = verf.f32 %v1165_v19  ;;  %v1647_v10 = vpack.c.bf16 %v3754_v24, %v3717_v43 }
 0x195   : > { %4884 = vst [vmem:[#allocation13_spill] sm:$0xff] %v3853_v34  ;;  %4885 = vst [vmem:[#allocation14_spill] sm:$0xff] %v3855_v62  ;;  %v2976_v3 = vpop.eup %2975  ;;  %v3867_v33 = vpop.f32.mrb[27].mxu0  ;;  %v3872_v34 = vmul.f32 %v1408_v41, %v3774_v4  ;;  %v1411_v62 = vadd.f32 1.0, %v2974_v12  ;;  %2010 = vmatprep.mubr.bf16.mxu0 %v1648_v6  ;;  %v696_v4 = vadd.f32 %v3744_v7, %v3623_v25  ;;  %v3887_v12 = vmul.f32 0.5, %v694_v31 }
 0x196   : > { %v3869_v15 = vpop.f32.mrb[27].mxu1  ;;  %v2978_v32 = vpop.eup %2977  ;;  %v889_v41 = vadd.f32 %v3746_v13, %v3625_v26  ;;  %2171 = vmatprep.mubr.bf16.mxu1 %v1650_v51  ;;  %v1649_v8 = vpack.c.bf16 %v3767_v45, %v3720_v49  ;;  %2993 = verf.f32 %v1164_v37  ;;  %2011 = vmatmul.mubr.bf16.gmra.mrb[68].mxu0 %v1647_v10  ;;  %v698_v43 = vadd.f32 %v3751_v18, %v3627_v27 }
 0x197   : > { %4886 = vst [vmem:[#allocation15_spill] sm:$0xff] %v3869_v15  ;;  %v2980_v23 = vpop.eup %2979  ;;  %v1413_v15 = vadd.f32 1.0, %v2976_v3  ;;  %v1412_v9 = vadd.f32 1.0, %v2978_v32  ;;  %v3894_v38 = vmul.f32 %v1411_v62, %v3808_v20  ;;  %v1167_v7 = vmul.f32 0.70710677, %v696_v4 }
 0x198   : > { %v2982_v36 = vpop.eup %2981  ;;  %v1414_v53 = vadd.f32 1.0, %v2980_v23  ;;  %v3898_v3 = vmul.f32 0.5, %v887_v61  ;;  %2995 = verf.f32 %v1166_v48  ;;  %v1169_v31 = vmul.f32 0.70710677, %v889_v41  ;;  %2172 = vmatmul.mubr.bf16.gmra.mrb[68].mxu1 %v1649_v8 }
 0x199   : > { %v2984_v52 = vpop.eup %2983  ;;  %v3907_v20 = vmul.f32 %v1413_v15, %v3812_v1  ;;  %2997 = verf.f32 %v1167_v7  ;;  %v891_v61 = vadd.f32 %v3760_v35, %v3629_v0  ;;  %v702_v37 = vadd.f32 %v3786_v63, %v3623_v25 }
 0x19a   : > { %v3896_v19 = vpop.f32.mrb[28].mxu0  ;;  %v2986_v13 = vpop.eup %2985  ;;  %v3918_v6 = vmul.f32 %v1412_v9, %v3814_v2  ;;  %v1415_v23 = vadd.f32 1.0, %v2982_v36  ;;  %v1417_v48 = vadd.f32 1.0, %v2984_v52  ;;  %2999 = verf.f32 %v1169_v31 }
 0x19b   : > { %v3902_v49 = vpop.f32.mrb[28].mxu1  ;;  %v3904_v24 = vpop.f32.mrb[29].mxu0  ;;  %v3925_v35 = vmul.f32 %v1414_v53, %v3823_v58  ;;  %v1416_v51 = vadd.f32 1.0, %v2986_v13  ;;  %v1168_v63 = vmul.f32 0.70710677, %v698_v43  ;;  %v3927_v7 = vmul.f32 0.5, %v696_v4 }
 0x19c   : > { %v2988_v45 = vpop.eup %2987  ;;  %v3913_v62 = vpop.f32.mrb[29].mxu1  ;;  %v1170_v10 = vmul.f32 0.70710677, %v891_v61  ;;  %v895_v2 = vadd.f32 %v3788_v30, %v3625_v26  ;;  %v704_v52 = vadd.f32 %v3794_v54, %v3627_v27  ;;  %v897_v58 = vadd.f32 %v3796_v42, %v3629_v0 }
 0x19d   : > { %v3915_v32 = vpop.f32.mrb[30].mxu0  ;;  %v2990_v18 = vpop.eup %2989  ;;  %v1418_v8 = vadd.f32 1.0, %v2988_v45  ;;  %3001 = verf.f32 %v1168_v63  ;;  %v3938_v53 = vmul.f32 %v1415_v23, %v3838_v57  ;;  %v3941_v4 = vmul.f32 %v1417_v48, %v3849_v59 }
 0x19e   : > { %4887 = vst [vmem:[#allocation16_spill] sm:$0xff] %v3915_v32  ;;  %v3920_v1 = vpop.f32.mrb[30].mxu1  ;;  %v3922_v15 = vpop.f32.mrb[31].mxu0  ;;  %v1171_v32 = vmul.f32 0.70710677, %v702_v37  ;;  %v1419_v9 = vadd.f32 1.0, %v2990_v18  ;;  %v3946_v45 = vmul.f32 %v1416_v51, %v3851_v17  ;;  %3003 = verf.f32 %v1170_v10 }
 0x19f   : > { %v3931_v36 = vpop.f32.mrb[31].mxu1  ;;  %v3943_v13 = vmul.f32 0.5, %v889_v41  ;;  %v1173_v31 = vmul.f32 0.70710677, %v895_v2  ;;  %v2992_v30 = vpop.eup %2991  ;;  %v3948_v18 = vmul.f32 0.5, %v698_v43  ;;  %v3955_v57 = vmul.f32 %v1418_v8, %v3863_v46 }
 0x1a0   : > { %v1172_v54 = vmul.f32 0.70710677, %v704_v52  ;;  %v3957_v59 = vmul.f32 0.5, %v891_v61  ;;  %v3959_v41 = vmul.f32 0.5, %v702_v37  ;;  %3005 = verf.f32 %v1171_v32  ;;  %v2994_v43 = vpop.eup %2993 }
 0x1a1   : > { %v3966_v48 = vmul.f32 %v1419_v9, %v3865_v56  ;;  %3007 = verf.f32 %v1173_v31  ;;  %v1174_v51 = vmul.f32 0.70710677, %v897_v58  ;;  %v1652_v10 = vpack.c.bf16 %v3872_v34, %v3828_v29 }
 0x1a2   : > { %v3950_v63 = vpop.f32.mrb[32].mxu0  ;;  %v3952_v42 = vpop.f32.mrb[32].mxu1  ;;  %v1421_v8 = vadd.f32 1.0, %v2992_v30  ;;  %v1654_v32 = vpack.c.bf16 %v3877_v50, %v3847_v55  ;;  %v899_v56 = vadd.f32 %v3803_v22, %v3625_v26  ;;  %3009 = verf.f32 %v1172_v54 }
 0x1a3   : > { %v3961_v23 = vpop.f32.mrb[33].mxu0  ;;  %v3963_v17 = vpop.f32.mrb[33].mxu1  ;;  %2018 = vmatprep.mubr.bf16.mxu0 %v1652_v10  ;;  %v1651_v34 = vpack.c.bf16 %v3858_v21, %v3806_v16  ;;  %v1653_v30 = vpack.c.bf16 %v3861_v60, %v3821_v28  ;;  %v708_v55 = vadd.f32 %v3810_v14, %v3627_v27  ;;  %v1420_v50 = vadd.f32 1.0, %v2994_v43 }
 0x1a4   : > { %4888 = vst [vmem:[#allocation17_spill] sm:$0xff] %v3963_v17  ;;  %v3970_v46 = vpop.f32.mrb[34].mxu0  ;;  %v3972_v61 = vpop.f32.mrb[34].mxu1  ;;  %v706_v17 = vadd.f32 %v3801_v5, %v3623_v25  ;;  %3011 = verf.f32 %v1174_v51  ;;  %2179 = vmatprep.mubr.bf16.mxu1 %v1654_v32  ;;  %v1177_v54 = vmul.f32 0.70710677, %v899_v56  ;;  %v3995_v21 = vmul.f32 %v1421_v8, %v3879_v44 }
 0x1a5   : > { %4889 = vst [vmem:[#allocation18_spill] sm:$0xff] %v3972_v61  ;;  %v2996_v37 = vpop.eup %2995  ;;  %v3980_v9 = vpop.f32.mrb[35].mxu0  ;;  %v3990_v61 = vmul.f32 0.5, %v895_v2  ;;  %2019 = vmatmul.mubr.bf16.gmra.mrb[72].mxu0 %v1651_v34  ;;  %2180 = vmatmul.mubr.bf16.gmra.mrb[72].mxu1 %v1653_v30  ;;  %v1176_v16 = vmul.f32 0.70710677, %v708_v55  ;;  %v901_v14 = vadd.f32 %v3818_v47, %v3629_v0  ;;  %v712_v28 = vadd.f32 %v3834_v11, %v3623_v25 }
 0x1a6   : > { %4890 = vst [vmem:[#allocation19_spill] sm:$0xff] %v3980_v9  ;;  %v3982_v31 = vpop.f32.mrb[35].mxu1  ;;  %v2998_v29 = vpop.eup %2997  ;;  %v1175_v22 = vmul.f32 0.70710677, %v706_v17  ;;  %v3992_v9 = vmul.f32 0.5, %v704_v52  ;;  %v905_v52 = vadd.f32 %v3836_v39, %v3625_v26  ;;  %v4008_v44 = vmul.f32 %v1420_v50, %v3887_v12 }
 0x1a7   : > { %4891 = vst [vmem:[#allocation20_spill] sm:$0xff] %v3982_v31  ;;  %v3000_v5 = vpop.eup %2999  ;;  %v1422_v31 = vadd.f32 1.0, %v2996_v37  ;;  %v1423_v2 = vadd.f32 1.0, %v2998_v29  ;;  %v4010_v37 = vmul.f32 0.5, %v897_v58  ;;  %v1178_v47 = vmul.f32 0.70710677, %v901_v14 }
 0x1a8   : > { %3013 = verf.f32 %v1175_v22  ;;  %v3002_v60 = vpop.eup %3001  ;;  %v1425_v43 = vadd.f32 1.0, %v3000_v5  ;;  %v714_v11 = vadd.f32 %v3842_v40, %v3627_v27  ;;  %v4021_v34 = vmul.f32 0.5, %v706_v17 }
 0x1a9   : > { %3015 = verf.f32 %v1177_v54  ;;  %v3004_v29 = vpop.eup %3003  ;;  %v4019_v39 = vmul.f32 %v1422_v31, %v3898_v3  ;;  %v1179_v30 = vmul.f32 0.70710677, %v712_v28  ;;  %v1424_v5 = vadd.f32 1.0, %v3002_v60 }
 0x1aa   : > { %v4003_v51 = vpop.f32.mrb[36].mxu0  ;;  %v4005_v10 = vpop.f32.mrb[36].mxu1  ;;  %3017 = verf.f32 %v1176_v16  ;;  %v4025_v50 = vmul.f32 0.5, %v899_v56  ;;  %v4027_v22 = vmul.f32 0.5, %v708_v55  ;;  %v4034_v3 = vmul.f32 %v1423_v2, %v3927_v7 }
 0x1ab   : > { %v4014_v8 = vpop.f32.mrb[37].mxu0  ;;  %v4016_v32 = vpop.f32.mrb[37].mxu1  ;;  %3019 = verf.f32 %v1178_v47  ;;  %v4037_v17 = vmul.f32 %v1425_v43, %v3943_v13  ;;  %v4039_v31 = vmul.f32 0.5, %v901_v14  ;;  %v1181_v16 = vmul.f32 0.70710677, %v905_v52 }
 0x1ac   : > { %4892 = vst [vmem:[#allocation21_spill] sm:$0xff] %v4014_v8  ;;  %4893 = vst [vmem:[#allocation22_spill] sm:$0xff] %v4016_v32  ;;  %v4023_v12 = vpop.f32.mrb[38].mxu0  ;;  %v3006_v58 = vpop.eup %3005  ;;  %v1426_v56 = vadd.f32 1.0, %v3004_v29  ;;  %v4043_v55 = vmul.f32 0.5, %v712_v28  ;;  %3021 = verf.f32 %v1179_v30  ;;  %v1656_v13 = vpack.c.bf16 %v3946_v45, %v3918_v6  ;;  %v4899_v30 = vld [vmem:[#allocation13_spill] sm:$0xff] }
 0x1ad   : > { %4894 = vst [vmem:[#allocation23_spill] sm:$0xff] %v4023_v12  ;;  %v4029_v40 = vpop.f32.mrb[38].mxu1  ;;  %v4031_v54 = vpop.f32.mrb[39].mxu0  ;;  %v1180_v47 = vmul.f32 0.70710677, %v714_v11  ;;  %v4045_v12 = vmul.f32 0.5, %v905_v52  ;;  %v1658_v14 = vpack.c.bf16 %v3955_v57, %v3925_v35  ;;  %v4054_v43 = vmul.f32 %v1424_v5, %v3948_v18 }
 0x1ae   : > { %4895 = vst [vmem:[#allocation24_spill] sm:$0xff] %v4029_v40  ;;  %4896 = vst [vmem:[#allocation25_spill] sm:$0xff] %v4031_v54  ;;  %v3008_v32 = vpop.eup %3007  ;;  %v4041_v60 = vpop.f32.mrb[39].mxu1  ;;  %v4898_v54 = vld [vmem:[#allocation12_spill] sm:$0xff]  ;;  %v1427_v28 = vadd.f32 1.0, %v3006_v58  ;;  %3023 = verf.f32 %v1181_v16  ;;  %2026 = vmatprep.mubr.bf16.mxu0 %v1656_v13  ;;  %v1655_v6 = vpack.c.bf16 %v3938_v53, %v3894_v38  ;;  %v1657_v58 = vpack.c.bf16 %v3941_v4, %v3907_v20  ;;  %v4903_v4 = vld [vmem:[#allocation15_spill] sm:$0xff] }
 0x1af   : > { %4897 = vst [vmem:[#allocation26_spill] sm:$0xff] %v4041_v60  ;;  %v3010_v40 = vpop.eup %3009  ;;  %v907_v7 = vadd.f32 %v4898_v54, %v3629_v0  ;;  %v1429_v29 = vadd.f32 1.0, %v3008_v32  ;;  %v716_v60 = vadd.f32 %v4899_v30, %v3623_v25  ;;  %2187 = vmatprep.mubr.bf16.mxu1 %v1658_v14  ;;  %v4900_v54 = vld [vmem:[#allocation14_spill] sm:$0xff]  ;;  %3025 = verf.f32 %v1180_v47 }
 0x1b0   : > { %v3012_v2 = vpop.eup %3011  ;;  %v909_v8 = vadd.f32 %v4900_v54, %v3625_v26  ;;  %v1428_v57 = vadd.f32 1.0, %v3010_v40  ;;  %v4073_v14 = vmul.f32 %v1426_v56, %v3957_v59  ;;  %2027 = vmatmul.mubr.bf16.gmra.mrb[76].mxu0 %v1655_v6  ;;  %v4079_v47 = vmul.f32 0.5, %v714_v11  ;;  %2188 = vmatmul.mubr.bf16.gmra.mrb[76].mxu1 %v1657_v58 }
 0x1b1   : > { %v1182_v52 = vmul.f32 0.70710677, %v907_v7  ;;  %v1183_v32 = vmul.f32 0.70710677, %v716_v60  ;;  %v1430_v38 = vadd.f32 1.0, %v3012_v2  ;;  %v718_v20 = vadd.f32 %v3867_v33, %v3627_v27 }
 0x1b2   : > { %v4062_v35 = vpop.f32.mrb[40].mxu0  ;;  %v4064_v45 = vpop.f32.mrb[40].mxu1  ;;  %v1185_v53 = vmul.f32 0.70710677, %v909_v8  ;;  %v911_v54 = vadd.f32 %v4903_v4, %v3629_v0  ;;  %v722_v11 = vadd.f32 %v3896_v19, %v3623_v25  ;;  %v4095_v58 = vmul.f32 %v1429_v29, %v3990_v61 }
 0x1b3   : > { %v3014_v18 = vpop.eup %3013  ;;  %v4068_v5 = vpop.f32.mrb[41].mxu0  ;;  %3027 = verf.f32 %v1182_v52  ;;  %v4090_v52 = vmul.f32 %v1427_v28, %v3959_v41  ;;  %v4098_v33 = vmul.f32 %v1428_v57, %v3992_v9  ;;  %v4105_v41 = vmul.f32 0.5, %v716_v60 }
 0x1b4   : > { %v4070_v16 = vpop.f32.mrb[41].mxu1  ;;  %v3016_v13 = vpop.eup %3015  ;;  %3029 = verf.f32 %v1183_v32  ;;  %v1431_v6 = vadd.f32 1.0, %v3014_v18  ;;  %v1186_v28 = vmul.f32 0.70710677, %v911_v54  ;;  %v4107_v19 = vmul.f32 0.5, %v909_v8 }
 0x1b5   : > { %v4075_v30 = vpop.f32.mrb[42].mxu0  ;;  %v4077_v40 = vpop.f32.mrb[42].mxu1  ;;  %3031 = verf.f32 %v1185_v53  ;;  %v1433_v4 = vadd.f32 1.0, %v3016_v13  ;;  %v915_v61 = vadd.f32 %v3902_v49, %v3625_v26  ;;  %v4123_v8 = vmul.f32 0.5, %v718_v20 }
 0x1b6   : > { %4901 = vst [vmem:[#allocation12_spill] sm:$0xff] %v4075_v30  ;;  %4902 = vst [vmem:[#allocation13_spill] sm:$0xff] %v4077_v40  ;;  %v4085_v59 = vpop.f32.mrb[43].mxu0  ;;  %v4087_v56 = vpop.f32.mrb[43].mxu1  ;;  %v4103_v40 = vmul.f32 0.5, %v907_v7  ;;  %v4112_v9 = vmul.f32 %v1431_v6, %v4021_v34 }
 0x1b7   : > { %4904 = vst [vmem:[#allocation14_spill] sm:$0xff] %v4085_v59  ;;  %4905 = vst [vmem:[#allocation15_spill] sm:$0xff] %v4087_v56  ;;  %v3018_v2 = vpop.eup %3017  ;;  %v1184_v59 = vmul.f32 0.70710677, %v718_v20  ;;  %v4101_v56 = vmul.f32 %v1430_v38, %v4010_v37  ;;  %v1187_v30 = vmul.f32 0.70710677, %v722_v11  ;;  %v724_v37 = vadd.f32 %v3904_v24, %v3627_v27 }
 0x1b8   : > { %v3020_v32 = vpop.eup %3019  ;;  %v1432_v53 = vadd.f32 1.0, %v3018_v2  ;;  %v4121_v57 = vmul.f32 %v1433_v4, %v4025_v50  ;;  %v1189_v13 = vmul.f32 0.70710677, %v915_v61  ;;  %v4129_v2 = vmul.f32 0.5, %v911_v54 }
 0x1b9   : > { %v3022_v18 = vpop.eup %3021  ;;  %v1434_v29 = vadd.f32 1.0, %v3020_v32  ;;  %3033 = verf.f32 %v1184_v59  ;;  %v1188_v24 = vmul.f32 0.70710677, %v724_v37  ;;  %v917_v4 = vadd.f32 %v3913_v62, %v3629_v0 }
 0x1ba   : > { %v4116_v7 = vpop.f32.mrb[44].mxu0  ;;  %v4118_v60 = vpop.f32.mrb[44].mxu1  ;;  %3035 = verf.f32 %v1186_v28  ;;  %v1435_v59 = vadd.f32 1.0, %v3022_v18  ;;  %v4136_v20 = vmul.f32 %v1432_v53, %v4027_v22  ;;  %v1660_v28 = vpack.c.bf16 %v4054_v43, %v4008_v44  ;;  %v4911_v22 = vld [vmem:[#allocation16_spill] sm:$0xff] }
 0x1bb   : > { %v4125_v49 = vpop.f32.mrb[45].mxu0  ;;  %v4127_v34 = vpop.f32.mrb[45].mxu1  ;;  %3037 = verf.f32 %v1187_v30  ;;  %v1662_v54 = vpack.c.bf16 %v4073_v14, %v4019_v39  ;;  %v726_v53 = vadd.f32 %v4911_v22, %v3623_v25  ;;  %v919_v62 = vadd.f32 %v3920_v1, %v3625_v26 }
 0x1bc   : > { %4906 = vst [vmem:[#allocation27_spill] sm:$0xff] %v4127_v34  ;;  %v3024_v38 = vpop.eup %3023  ;;  %v4131_v6 = vpop.f32.mrb[46].mxu0  ;;  %v4151_v34 = vmul.f32 0.5, %v722_v11  ;;  %3039 = verf.f32 %v1189_v13  ;;  %v1190_v39 = vmul.f32 0.70710677, %v917_v4  ;;  %2034 = vmatprep.mubr.bf16.mxu0 %v1660_v28  ;;  %v1659_v14 = vpack.c.bf16 %v4034_v3, %v3966_v48 }
 0x1bd   : > { %4907 = vst [vmem:[#allocation28_spill] sm:$0xff] %v4131_v6  ;;  %v4133_v32 = vpop.f32.mrb[46].mxu1  ;;  %v3026_v50 = vpop.eup %3025  ;;  %v1437_v43 = vadd.f32 1.0, %v3024_v38  ;;  %2195 = vmatprep.mubr.bf16.mxu1 %v1662_v54  ;;  %v4162_v11 = vmul.f32 0.5, %v915_v61  ;;  %3041 = verf.f32 %v1188_v24  ;;  %v1193_v1 = vmul.f32 0.70710677, %v919_v62 }
 0x1be   : > { %4908 = vst [vmem:[#allocation29_spill] sm:$0xff] %v4133_v32  ;;  %v4144_v18 = vpop.f32.mrb[47].mxu0  ;;  %v4146_v30 = vpop.f32.mrb[47].mxu1  ;;  %v4149_v32 = vmul.f32 %v1434_v29, %v4039_v31  ;;  %v4160_v31 = vmul.f32 %v1435_v59, %v4043_v55  ;;  %v1191_v29 = vmul.f32 0.70710677, %v726_v53  ;;  %v1436_v22 = vadd.f32 1.0, %v3026_v50  ;;  %2035 = vmatmul.mubr.bf16.gmra.mrb[80].mxu0 %v1659_v14 }
 0x1bf   : > { %4909 = vst [vmem:[#allocation30_spill] sm:$0xff] %v4144_v18  ;;  %4910 = vst [vmem:[#allocation31_spill] sm:$0xff] %v4146_v30  ;;  %v3028_v6 = vpop.eup %3027  ;;  %3043 = verf.f32 %v1190_v39  ;;  %v1661_v38 = vpack.c.bf16 %v4037_v17, %v3995_v21  ;;  %v728_v48 = vadd.f32 %v3922_v15, %v3627_v27  ;;  %v921_v59 = vadd.f32 %v3931_v36, %v3629_v0 }
 0x1c0   : > { %v3030_v44 = vpop.eup %3029  ;;  %v1438_v18 = vadd.f32 1.0, %v3028_v6  ;;  %3045 = verf.f32 %v1191_v29  ;;  %v732_v24 = vadd.f32 %v3950_v63, %v3623_v25  ;;  %v4181_v17 = vmul.f32 %v1437_v43, %v4045_v12 }
 0x1c1   : > { %v3032_v30 = vpop.eup %3031  ;;  %v1439_v13 = vadd.f32 1.0, %v3030_v44  ;;  %3047 = verf.f32 %v1193_v1  ;;  %v4183_v15 = vmul.f32 0.5, %v724_v37  ;;  %2196 = vmatmul.mubr.bf16.gmra.mrb[80].mxu1 %v1661_v38  ;;  %v1192_v28 = vmul.f32 0.70710677, %v728_v48 }
 0x1c2   : > { %v4168_v3 = vpop.f32.mrb[48].mxu0  ;;  %v4170_v55 = vpop.f32.mrb[48].mxu1  ;;  %v1441_v61 = vadd.f32 1.0, %v3032_v30  ;;  %v925_v54 = vadd.f32 %v3952_v42, %v3625_v26  ;;  %v4192_v44 = vmul.f32 %v1436_v22, %v4079_v47  ;;  %v4194_v39 = vmul.f32 0.5, %v917_v4 }
 0x1c3   : > { %v4176_v6 = vpop.f32.mrb[49].mxu0  ;;  %v4178_v50 = vpop.f32.mrb[49].mxu1  ;;  %v4196_v14 = vmul.f32 0.5, %v726_v53  ;;  %v1194_v12 = vmul.f32 0.70710677, %v921_v59  ;;  %v4201_v29 = vmul.f32 %v1438_v18, %v4103_v40  ;;  %v4203_v42 = vmul.f32 0.5, %v919_v62 }
 0x1c4   : > { %v3034_v21 = vpop.eup %3033  ;;  %v4187_v30 = vpop.f32.mrb[50].mxu0  ;;  %3049 = verf.f32 %v1192_v28  ;;  %v1195_v1 = vmul.f32 0.70710677, %v732_v24  ;;  %v4208_v47 = vmul.f32 %v1439_v13, %v4105_v41  ;;  %v4211_v4 = vmul.f32 %v1441_v61, %v4107_v19  ;;  %v4915_v28 = vld [vmem:[#allocation17_spill] sm:$0xff] }
 0x1c5   : > { %v4189_v36 = vpop.f32.mrb[50].mxu1  ;;  %v3036_v63 = vpop.eup %3035  ;;  %v1440_v53 = vadd.f32 1.0, %v3034_v21  ;;  %v1197_v22 = vmul.f32 0.70710677, %v925_v54  ;;  %3051 = verf.f32 %v1194_v12  ;;  %v734_v40 = vadd.f32 %v3961_v23, %v3627_v27 }
 0x1c6   : > { %4912 = vst [vmem:[#allocation16_spill] sm:$0xff] %v4189_v36  ;;  %v4198_v37 = vpop.f32.mrb[51].mxu0  ;;  %v3038_v43 = vpop.eup %3037  ;;  %v1442_v36 = vadd.f32 1.0, %v3036_v63  ;;  %3053 = verf.f32 %v1195_v1  ;;  %v1664_v41 = vpack.c.bf16 %v4136_v20, %v4098_v33  ;;  %v4221_v13 = vmul.f32 0.5, %v921_v59 }
 0x1c7   : > { %4913 = vst [vmem:[#allocation32_spill] sm:$0xff] %v4198_v37  ;;  %v4205_v38 = vpop.f32.mrb[51].mxu1  ;;  %v4213_v37 = vmul.f32 0.5, %v728_v48  ;;  %v3040_v18 = vpop.eup %3039  ;;  %v1443_v62 = vadd.f32 1.0, %v3038_v43  ;;  %v4223_v61 = vmul.f32 0.5, %v732_v24  ;;  %v1666_v21 = vpack.c.bf16 %v4149_v32, %v4101_v56 }
 0x1c8   : > { %4914 = vst [vmem:[#allocation33_spill] sm:$0xff] %v4205_v38  ;;  %v927_v38 = vadd.f32 %v4915_v28, %v3629_v0  ;;  %v3042_v19 = vpop.eup %3041  ;;  %v1196_v48 = vmul.f32 0.70710677, %v734_v40  ;;  %v4232_v43 = vmul.f32 %v1440_v53, %v4123_v8  ;;  %3055 = verf.f32 %v1197_v22  ;;  %2042 = vmatprep.mubr.bf16.mxu0 %v1664_v41  ;;  %v4919_v8 = vld [vmem:[#allocation18_spill] sm:$0xff] }
 0x1c9   : > { %v3044_v12 = vpop.eup %3043  ;;  %v736_v33 = vadd.f32 %v3970_v46, %v3623_v25  ;;  %v4241_v56 = vmul.f32 %v1442_v36, %v4129_v2  ;;  %v4243_v32 = vmul.f32 0.5, %v925_v54  ;;  %2203 = vmatprep.mubr.bf16.mxu1 %v1666_v21  ;;  %v929_v53 = vadd.f32 %v4919_v8, %v3625_v26 }
 0x1ca   : > { %v4227_v63 = vpop.f32.mrb[52].mxu0  ;;  %v4229_v23 = vpop.f32.mrb[52].mxu1  ;;  %v1198_v1 = vmul.f32 0.70710677, %v927_v38  ;;  %v1663_v22 = vpack.c.bf16 %v4112_v9, %v4090_v52  ;;  %3057 = verf.f32 %v1196_v48  ;;  %v1444_v21 = vadd.f32 1.0, %v3042_v19 }
 0x1cb   : > { %4916 = vst [vmem:[#allocation17_spill] sm:$0xff] %v4229_v23  ;;  %v4236_v20 = vpop.f32.mrb[53].mxu0  ;;  %v4238_v59 = vpop.f32.mrb[53].mxu1  ;;  %v1199_v2 = vmul.f32 0.70710677, %v736_v33  ;;  %v1446_v8 = vadd.f32 1.0, %v3044_v12  ;;  %v1665_v9 = vpack.c.bf16 %v4121_v57, %v4095_v58  ;;  %v742_v19 = vadd.f32 %v4003_v51, %v3623_v25 }
 0x1cc   : > { %4917 = vst [vmem:[#allocation34_spill] sm:$0xff] %v4236_v20  ;;  %4918 = vst [vmem:[#allocation35_spill] sm:$0xff] %v4238_v59  ;;  %v3046_v24 = vpop.eup %3045  ;;  %v4249_v28 = vpop.f32.mrb[54].mxu0  ;;  %v4254_v59 = vmul.f32 %v1443_v62, %v4151_v34  ;;  %v1445_v20 = vadd.f32 1.0, %v3040_v18  ;;  %3059 = verf.f32 %v1198_v1  ;;  %v1201_v23 = vmul.f32 0.70710677, %v929_v53  ;;  %2043 = vmatmul.mubr.bf16.gmra.mrb[84].mxu0 %v1663_v22 }
 0x1cd   : > { %v4251_v46 = vpop.f32.mrb[54].mxu1  ;;  %v3048_v41 = vpop.eup %3047  ;;  %v1447_v52 = vadd.f32 1.0, %v3046_v24  ;;  %3061 = verf.f32 %v1199_v2  ;;  %v4922_v34 = vld [vmem:[#allocation19_spill] sm:$0xff]  ;;  %v4271_v1 = vmul.f32 0.5, %v734_v40  ;;  %2204 = vmatmul.mubr.bf16.gmra.mrb[84].mxu1 %v1665_v9  ;;  %v935_v58 = vadd.f32 %v4005_v10, %v3625_v26 }
 0x1ce   : > { %4920 = vst [vmem:[#allocation18_spill] sm:$0xff] %v4251_v46  ;;  %v4256_v54 = vpop.f32.mrb[55].mxu0  ;;  %v4258_v36 = vpop.f32.mrb[55].mxu1  ;;  %v738_v62 = vadd.f32 %v4922_v34, %v3627_v27  ;;  %v1449_v48 = vadd.f32 1.0, %v3048_v41  ;;  %3063 = verf.f32 %v1201_v23  ;;  %v4269_v12 = vmul.f32 %v1445_v20, %v4162_v11 }
 0x1cf   : > { %4921 = vst [vmem:[#allocation36_spill] sm:$0xff] %v4256_v54  ;;  %v3050_v18 = vpop.eup %3049  ;;  %v4923_v54 = vld [vmem:[#allocation20_spill] sm:$0xff]  ;;  %v4276_v22 = vmul.f32 %v1444_v21, %v4183_v15  ;;  %v4278_v23 = vmul.f32 0.5, %v927_v38  ;;  %v4280_v41 = vmul.f32 0.5, %v736_v33  ;;  %v4285_v40 = vmul.f32 %v1446_v8, %v4194_v39 }
 0x1d0   : > { %v931_v46 = vadd.f32 %v4923_v54, %v3629_v0  ;;  %v1200_v24 = vmul.f32 0.70710677, %v738_v62  ;;  %v3052_v57 = vpop.eup %3051  ;;  %v1448_v20 = vadd.f32 1.0, %v3050_v18  ;;  %v4287_v54 = vmul.f32 0.5, %v929_v53 }
 0x1d1   : > { %v3054_v11 = vpop.eup %3053  ;;  %v4294_v15 = vmul.f32 %v1447_v52, %v4196_v14  ;;  %v4297_v38 = vmul.f32 %v1449_v48, %v4203_v42  ;;  %v1203_v33 = vmul.f32 0.70710677, %v742_v19  ;;  %v1450_v53 = vadd.f32 1.0, %v3052_v57  ;;  %v4932_v52 = vld [vmem:[#allocation22_spill] sm:$0xff] }
 0x1d2   : > { %v1202_v2 = vmul.f32 0.70710677, %v931_v46  ;;  %v4282_v51 = vpop.f32.mrb[56].mxu0  ;;  %3065 = verf.f32 %v1200_v24  ;;  %v4289_v10 = vpop.f32.mrb[56].mxu1  ;;  %v4303_v34 = vmul.f32 0.5, %v738_v62  ;;  %v4929_v24 = vld [vmem:[#allocation21_spill] sm:$0xff]  ;;  %v937_v48 = vadd.f32 %v4932_v52, %v3629_v0 }
 0x1d3   : > { %4924 = vst [vmem:[#allocation19_spill] sm:$0xff] %v4282_v51  ;;  %4925 = vst [vmem:[#allocation20_spill] sm:$0xff] %v4289_v10  ;;  %v4291_v9 = vpop.f32.mrb[57].mxu0  ;;  %v4299_v21 = vpop.f32.mrb[57].mxu1  ;;  %v1205_v18 = vmul.f32 0.70710677, %v935_v58  ;;  %v1670_v57 = vpack.c.bf16 %v4241_v56, %v4201_v29  ;;  %v4329_v56 = vmul.f32 %v1450_v53, %v4221_v13 }
 0x1d4   : > { %4926 = vst [vmem:[#allocation37_spill] sm:$0xff] %v4291_v9  ;;  %3067 = verf.f32 %v1202_v2  ;;  %4927 = vst [vmem:[#allocation38_spill] sm:$0xff] %v4299_v21  ;;  %v4301_v39 = vpop.f32.mrb[58].mxu0  ;;  %v3056_v8 = vpop.eup %3055  ;;  %v744_v9 = vadd.f32 %v4929_v24, %v3627_v27  ;;  %v1451_v42 = vadd.f32 1.0, %v3054_v11  ;;  %v1668_v2 = vpack.c.bf16 %v4232_v43, %v4192_v44  ;;  %v4933_v44 = vld [vmem:[#allocation23_spill] sm:$0xff] }
 0x1d5   : > { %4928 = vst [vmem:[#allocation39_spill] sm:$0xff] %v4301_v39  ;;  %v4307_v10 = vpop.f32.mrb[58].mxu1  ;;  %v4309_v14 = vpop.f32.mrb[59].mxu0  ;;  %v4320_v21 = vmul.f32 %v1448_v20, %v4213_v37  ;;  %v4322_v24 = vmul.f32 0.5, %v931_v46  ;;  %v1453_v51 = vadd.f32 1.0, %v3056_v8  ;;  %3069 = verf.f32 %v1203_v33  ;;  %2211 = vmatprep.mubr.bf16.mxu1 %v1670_v57  ;;  %v4934_v37 = vld [vmem:[#allocation24_spill] sm:$0xff] }
 0x1d6   : > { %4930 = vst [vmem:[#allocation21_spill] sm:$0xff] %v4307_v10  ;;  %4931 = vst [vmem:[#allocation40_spill] sm:$0xff] %v4309_v14  ;;  %v4317_v62 = vpop.f32.mrb[59].mxu1  ;;  %v3058_v39 = vpop.eup %3057  ;;  %v4324_v10 = vmul.f32 0.5, %v742_v19  ;;  %v1204_v11 = vmul.f32 0.70710677, %v744_v9  ;;  %2050 = vmatprep.mubr.bf16.mxu0 %v1668_v2  ;;  %v746_v29 = vadd.f32 %v4933_v44, %v3623_v25  ;;  %3071 = verf.f32 %v1205_v18 }
 0x1d7   : > { %v3060_v14 = vpop.eup %3059  ;;  %v1206_v52 = vmul.f32 0.70710677, %v937_v48  ;;  %v939_v46 = vadd.f32 %v4934_v37, %v3625_v26  ;;  %v1667_v19 = vpack.c.bf16 %v4208_v47, %v4160_v31  ;;  %v4336_v33 = vmul.f32 %v1451_v42, %v4223_v61  ;;  %v4936_v47 = vld [vmem:[#allocation25_spill] sm:$0xff] }
 0x1d8   : > { %v3062_v43 = vpop.eup %3061  ;;  %v1452_v8 = vadd.f32 1.0, %v3058_v39  ;;  %v4338_v2 = vmul.f32 0.5, %v935_v58  ;;  %3073 = verf.f32 %v1204_v11  ;;  %v1454_v13 = vadd.f32 1.0, %v3060_v14  ;;  %v4937_v58 = vld [vmem:[#allocation26_spill] sm:$0xff] }
 0x1d9   : > { %v3064_v20 = vpop.eup %3063  ;;  %3075 = verf.f32 %v1206_v52  ;;  %v1207_v53 = vmul.f32 0.70710677, %v746_v29  ;;  %v1209_v18 = vmul.f32 0.70710677, %v939_v46  ;;  %2051 = vmatmul.mubr.bf16.gmra.mrb[88].mxu0 %v1667_v19  ;;  %v4345_v37 = vmul.f32 %v1453_v51, %v4243_v32 }
 0x1da   : > { %v4340_v57 = vpop.f32.mrb[60].mxu0  ;;  %v4342_v44 = vpop.f32.mrb[60].mxu1  ;;  %v1669_v31 = vpack.c.bf16 %v4211_v4, %v4181_v17  ;;  %v748_v61 = vadd.f32 %v4936_v47, %v3627_v27  ;;  %v941_v39 = vadd.f32 %v4937_v58, %v3629_v0  ;;  %v1455_v52 = vadd.f32 1.0, %v3062_v43 }
 0x1db   : > { %4935 = vst [vmem:[#allocation22_spill] sm:$0xff] %v4342_v44  ;;  %v4353_v42 = vpop.f32.mrb[61].mxu0  ;;  %v4355_v11 = vpop.f32.mrb[61].mxu1  ;;  %v1457_v44 = vadd.f32 1.0, %v3064_v20  ;;  %3077 = verf.f32 %v1207_v53  ;;  %v752_v32 = vadd.f32 %v4062_v35, %v3623_v25  ;;  %v4363_v19 = vmul.f32 0.5, %v744_v9 }
 0x1dc   : > { %4938 = vst [vmem:[#allocation23_spill] sm:$0xff] %v4355_v11  ;;  %v3066_v14 = vpop.eup %3065  ;;  %v4359_v51 = vpop.f32.mrb[62].mxu0  ;;  %3079 = verf.f32 %v1209_v18  ;;  %2212 = vmatmul.mubr.bf16.gmra.mrb[88].mxu1 %v1669_v31  ;;  %v1208_v47 = vmul.f32 0.70710677, %v748_v61  ;;  %v945_v58 = vadd.f32 %v4064_v45, %v3625_v26  ;;  %v4372_v20 = vmul.f32 %v1452_v8, %v4271_v1 }
 0x1dd   : > { %4939 = vst [vmem:[#allocation24_spill] sm:$0xff] %v4359_v51  ;;  %v4361_v17 = vpop.f32.mrb[62].mxu1  ;;  %v4367_v11 = vpop.f32.mrb[63].mxu0  ;;  %v4375_v35 = vmul.f32 %v1454_v13, %v4278_v23  ;;  %v4377_v53 = vmul.f32 0.5, %v937_v48  ;;  %v1210_v9 = vmul.f32 0.70710677, %v941_v39  ;;  %v4384_v45 = vmul.f32 %v1455_v52, %v4280_v41 }
 0x1de   : > { %4940 = vst [vmem:[#allocation25_spill] sm:$0xff] %v4361_v17  ;;  %v3068_v4 = vpop.eup %3067  ;;  %v4369_v43 = vpop.f32.mrb[63].mxu1  ;;  %v1456_v17 = vadd.f32 1.0, %v3066_v14  ;;  %v4379_v18 = vmul.f32 0.5, %v746_v29  ;;  %v4381_v31 = vmul.f32 0.5, %v939_v46  ;;  %3081 = verf.f32 %v1208_v47 }
 0x1df   : > { %4941 = vst [vmem:[#allocation26_spill] sm:$0xff] %v4369_v43  ;;  %v1211_v51 = vmul.f32 0.70710677, %v752_v32  ;;  %v4387_v43 = vmul.f32 %v1457_v44, %v4287_v54  ;;  %v1458_v1 = vadd.f32 1.0, %v3068_v4  ;;  %v3070_v8 = vpop.eup %3069  ;;  %v4389_v23 = vmul.f32 0.5, %v748_v61 }
 0x1e0   : > { %3083 = verf.f32 %v1210_v9  ;;  %v1213_v48 = vmul.f32 0.70710677, %v945_v58  ;;  %v754_v29 = vadd.f32 %v4068_v5, %v3627_v27  ;;  %v3072_v13 = vpop.eup %3071  ;;  %v947_v46 = vadd.f32 %v4070_v16, %v3629_v0 }
 0x1e1   : > { %3085 = verf.f32 %v1211_v51  ;;  %v1672_v41 = vpack.c.bf16 %v4320_v21, %v4276_v22  ;;  %v1674_v54 = vpack.c.bf16 %v4329_v56, %v4285_v40  ;;  %v4400_v61 = vmul.f32 %v1456_v17, %v4303_v34  ;;  %v4942_v22 = vld [vmem:[#allocation12_spill] sm:$0xff]  ;;  %v4943_v34 = vld [vmem:[#allocation13_spill] sm:$0xff] }
 0x1e2   : > { %v3074_v44 = vpop.eup %3073  ;;  %v4402_v14 = vmul.f32 0.5, %v941_v39  ;;  %v4404_v52 = vmul.f32 0.5, %v752_v32  ;;  %v1212_v5 = vmul.f32 0.70710677, %v754_v29  ;;  %v4407_v51 = vmul.f32 %v1458_v1, %v4322_v24 }
 0x1e3   : > { %v3076_v4 = vpop.eup %3075  ;;  %v1459_v16 = vadd.f32 1.0, %v3070_v8  ;;  %v1214_v47 = vmul.f32 0.70710677, %v947_v46  ;;  %2058 = vmatprep.mubr.bf16.mxu0 %v1672_v41  ;;  %2219 = vmatprep.mubr.bf16.mxu1 %v1674_v54  ;;  %v756_v40 = vadd.f32 %v4942_v22, %v3623_v25  ;;  %v4411_v21 = vmul.f32 0.5, %v945_v58  ;;  %v4944_v54 = vld [vmem:[#allocation14_spill] sm:$0xff] }
 0x1e4   : > { %3087 = verf.f32 %v1213_v48  ;;  %v949_v56 = vadd.f32 %v4943_v34, %v3625_v26  ;;  %v1671_v39 = vpack.c.bf16 %v4294_v15, %v4254_v59  ;;  %v1461_v17 = vadd.f32 1.0, %v3072_v13  ;;  %v4945_v59 = vld [vmem:[#allocation15_spill] sm:$0xff] }
 0x1e5   : > { %v3078_v32 = vpop.eup %3077  ;;  %v1460_v24 = vadd.f32 1.0, %v3074_v44  ;;  %3089 = verf.f32 %v1212_v5  ;;  %v1215_v9 = vmul.f32 0.70710677, %v756_v40  ;;  %v1462_v8 = vadd.f32 1.0, %v3076_v4 }
 0x1e6   : > { %v3080_v1 = vpop.eup %3079  ;;  %3091 = verf.f32 %v1214_v47  ;;  %v1217_v41 = vmul.f32 0.70710677, %v949_v56  ;;  %2059 = vmatmul.mubr.bf16.gmra.mrb[92].mxu0 %v1671_v39  ;;  %v1673_v58 = vpack.c.bf16 %v4297_v38, %v4269_v12  ;;  %v1463_v48 = vadd.f32 1.0, %v3078_v32 }
 0x1e7   : > { %3093 = verf.f32 %v1215_v9  ;;  %v758_v22 = vadd.f32 %v4944_v54, %v3627_v27  ;;  %v951_v15 = vadd.f32 %v4945_v59, %v3629_v0  ;;  %v4424_v13 = vmul.f32 %v1459_v16, %v4324_v10 }
 0x1e8   : > { %v1465_v44 = vadd.f32 1.0, %v3080_v1  ;;  %3095 = verf.f32 %v1217_v41  ;;  %2220 = vmatmul.mubr.bf16.gmra.mrb[92].mxu1 %v1673_v58  ;;  %v762_v5 = vadd.f32 %v4116_v7, %v3623_v25  ;;  %v3082_v4 = vpop.eup %3081  ;;  %v4429_v12 = vmul.f32 %v1461_v17, %v4338_v2 }
 0x1e9   : > { %v4431_v38 = vmul.f32 0.5, %v754_v29  ;;  %v1216_v47 = vmul.f32 0.70710677, %v758_v22  ;;  %v955_v34 = vadd.f32 %v4118_v60, %v3625_v26  ;;  %v4436_v10 = vmul.f32 %v1460_v24, %v4363_v19 }
 0x1ea   : > { %v3084_v39 = vpop.eup %3083  ;;  %v4439_v16 = vmul.f32 %v1462_v8, %v4377_v53  ;;  %v4441_v32 = vmul.f32 0.5, %v947_v46  ;;  %v1218_v7 = vmul.f32 0.70710677, %v951_v15  ;;  %v4444_v2 = vmul.f32 %v1463_v48, %v4379_v18 }
 0x1eb   : > { %v3086_v9 = vpop.eup %3085  ;;  %v4446_v29 = vmul.f32 0.5, %v756_v40  ;;  %v4448_v17 = vmul.f32 0.5, %v949_v56  ;;  %v1219_v1 = vmul.f32 0.70710677, %v762_v5  ;;  %v4451_v60 = vmul.f32 %v1465_v44, %v4381_v31  ;;  %v4946_v40 = vld [vmem:[#allocation27_spill] sm:$0xff] }
 0x1ec   : > { %v1464_v19 = vadd.f32 1.0, %v3082_v4  ;;  %v4453_v24 = vmul.f32 0.5, %v758_v22  ;;  %3097 = verf.f32 %v1216_v47  ;;  %v1466_v53 = vadd.f32 1.0, %v3084_v39 }
 0x1ed   : > { %3099 = verf.f32 %v1218_v7  ;;  %v1221_v46 = vmul.f32 0.70710677, %v955_v34  ;;  %v764_v8 = vadd.f32 %v4125_v49, %v3627_v27  ;;  %v1467_v41 = vadd.f32 1.0, %v3086_v9 }
 0x1ee   : > { %v3088_v18 = vpop.eup %3087  ;;  %v957_v56 = vadd.f32 %v4946_v40, %v3629_v0  ;;  %v1676_v58 = vpack.c.bf16 %v4400_v61, %v4372_v20  ;;  %v1678_v31 = vpack.c.bf16 %v4407_v51, %v4375_v35  ;;  %v4463_v54 = vmul.f32 0.5, %v951_v15  ;;  %v4947_v20 = vld [vmem:[#allocation28_spill] sm:$0xff]  ;;  %v4948_v15 = vld [vmem:[#allocation29_spill] sm:$0xff] }
 0x1ef   : > { %v3090_v48 = vpop.eup %3089  ;;  %v4465_v22 = vmul.f32 0.5, %v762_v5  ;;  %3101 = verf.f32 %v1219_v1  ;;  %v1220_v59 = vmul.f32 0.70710677, %v764_v8  ;;  %v4468_v49 = vmul.f32 %v1464_v19, %v4389_v23 }
 0x1f0   : > { %v3092_v44 = vpop.eup %3091  ;;  %3103 = verf.f32 %v1221_v46  ;;  %v1222_v4 = vmul.f32 0.70710677, %v957_v56  ;;  %2066 = vmatprep.mubr.bf16.mxu0 %v1676_v58  ;;  %2227 = vmatprep.mubr.bf16.mxu1 %v1678_v31  ;;  %v766_v61 = vadd.f32 %v4947_v20, %v3623_v25  ;;  %v1594_v35 = vmul.f32 %v1466_v53, %v4402_v14 }
 0x1f1   : > { %v3094_v47 = vpop.eup %3093  ;;  %v1469_v51 = vadd.f32 1.0, %v3088_v18  ;;  %v959_v5 = vadd.f32 %v4948_v15, %v3625_v26  ;;  %v1675_v39 = vpack.c.bf16 %v4384_v45, %v4336_v33  ;;  %v4478_v23 = vmul.f32 %v1467_v41, %v4404_v52  ;;  %v4949_v18 = vld [vmem:[#allocation30_spill] sm:$0xff]  ;;  %v4950_v45 = vld [vmem:[#allocation31_spill] sm:$0xff] }
 0x1f2   : > { %v3096_v7 = vpop.eup %3095  ;;  %v1468_v9 = vadd.f32 1.0, %v3090_v48  ;;  %v4480_v1 = vmul.f32 0.5, %v955_v34  ;;  %3105 = verf.f32 %v1220_v59  ;;  %v1470_v19 = vadd.f32 1.0, %v3092_v44 }
 0x1f3   : > { %3107 = verf.f32 %v1222_v4  ;;  %v1223_v46 = vmul.f32 0.70710677, %v766_v61  ;;  %v1225_v40 = vmul.f32 0.70710677, %v959_v5  ;;  %2067 = vmatmul.mubr.bf16.gmra.mrb[96].mxu0 %v1675_v39  ;;  %v1471_v14 = vadd.f32 1.0, %v3094_v47 }
 0x1f4   : > { %v1677_v53 = vpack.c.bf16 %v4387_v43, %v4345_v37  ;;  %v768_v33 = vadd.f32 %v4949_v18, %v3627_v27  ;;  %v961_v52 = vadd.f32 %v4950_v45, %v3629_v0  ;;  %v1473_v41 = vadd.f32 1.0, %v3096_v7 }
 0x1f5   : > { %3109 = verf.f32 %v1223_v46  ;;  %v772_v34 = vadd.f32 %v4168_v3, %v3623_v25  ;;  %v965_v58 = vadd.f32 %v4170_v55, %v3625_v26  ;;  %v4493_v48 = vmul.f32 %v1469_v51, %v4411_v21 }
 0x1f6   : > { %v3098_v31 = vpop.eup %3097  ;;  %v4495_v59 = vmul.f32 0.5, %v764_v8  ;;  %3111 = verf.f32 %v1225_v40  ;;  %2228 = vmatmul.mubr.bf16.gmra.mrb[96].mxu1 %v1677_v53  ;;  %v1224_v37 = vmul.f32 0.70710677, %v768_v33  ;;  %v4498_v44 = vmul.f32 %v1468_v9, %v4431_v38 }
 0x1f7   : > { %v3100_v43 = vpop.eup %3099  ;;  %v4501_v4 = vmul.f32 %v1470_v19, %v4441_v32  ;;  %v4503_v3 = vmul.f32 0.5, %v957_v56  ;;  %v1226_v20 = vmul.f32 0.70710677, %v961_v52  ;;  %v4505_v55 = vmul.f32 0.5, %v766_v61 }
 0x1f8   : > { %v4507_v47 = vmul.f32 0.5, %v959_v5  ;;  %3113 = verf.f32 %v1224_v37  ;;  %v1227_v21 = vmul.f32 0.70710677, %v772_v34  ;;  %v4510_v51 = vmul.f32 %v1471_v14, %v4446_v29 }
 0x1f9   : > { %v3102_v8 = vpop.eup %3101  ;;  %v4513_v15 = vmul.f32 %v1473_v41, %v4448_v17  ;;  %3115 = verf.f32 %v1226_v20  ;;  %v1229_v38 = vmul.f32 0.70710677, %v965_v58  ;;  %v1472_v39 = vadd.f32 1.0, %v3098_v31 }
 0x1fa   : > { %v3104_v32 = vpop.eup %3103  ;;  %v1474_v56 = vadd.f32 1.0, %v3100_v43  ;;  %3117 = verf.f32 %v1227_v21  ;;  %v774_v61 = vadd.f32 %v4176_v6, %v3627_v27  ;;  %v4517_v5 = vmul.f32 0.5, %v768_v33 }
 0x1fb   : > { %v967_v7 = vadd.f32 %v4178_v50, %v3629_v0  ;;  %v1680_v29 = vpack.c.bf16 %v4468_v49, %v4436_v10  ;;  %v1682_v17 = vpack.c.bf16 %v1594_v35, %v4439_v16  ;;  %v1475_v19 = vadd.f32 1.0, %v3102_v8  ;;  %v4951_v49 = vld [vmem:[#allocation16_spill] sm:$0xff] }
 0x1fc   : > { %v3106_v9 = vpop.eup %3105  ;;  %v4524_v46 = vmul.f32 0.5, %v961_v52  ;;  %v4526_v40 = vmul.f32 0.5, %v772_v34  ;;  %v1228_v14 = vmul.f32 0.70710677, %v774_v61  ;;  %v1477_v18 = vadd.f32 1.0, %v3104_v32  ;;  %v4954_v32 = vld [vmem:[#allocation17_spill] sm:$0xff] }
 0x1fd   : > { %v3108_v53 = vpop.eup %3107  ;;  %3119 = verf.f32 %v1229_v38  ;;  %v1230_v6 = vmul.f32 0.70710677, %v967_v7  ;;  %2074 = vmatprep.mubr.bf16.mxu0 %v1680_v29  ;;  %2235 = vmatprep.mubr.bf16.mxu1 %v1682_v17  ;;  %v776_v50 = vadd.f32 %v4187_v30, %v3623_v25  ;;  %v1600_v10 = vmul.f32 %v1472_v39, %v4453_v24 }
 0x1fe   : > { %v1602_v16 = vmul.f32 %v1474_v56, %v4463_v54  ;;  %v969_v35 = vadd.f32 %v4951_v49, %v3625_v26  ;;  %v1679_v33 = vpack.c.bf16 %v4444_v2, %v4424_v13  ;;  %v1476_v52 = vadd.f32 1.0, %v3106_v9  ;;  %v4952_v13 = vld [vmem:[#allocation32_spill] sm:$0xff] }
 0x1ff   : > { %v3110_v45 = vpop.eup %3109  ;;  %v4536_v41 = vmul.f32 0.5, %v965_v58  ;;  %3121 = verf.f32 %v1228_v14  ;;  %v1231_v34 = vmul.f32 0.70710677, %v776_v50  ;;  %v1478_v37 = vadd.f32 1.0, %v3108_v53  ;;  %v4953_v58 = vld [vmem:[#allocation33_spill] sm:$0xff] }
 0x200   : > { %v3112_v31 = vpop.eup %3111  ;;  %3123 = verf.f32 %v1230_v6  ;;  %v1233_v30 = vmul.f32 0.70710677, %v969_v35  ;;  %2075 = vmatmul.mubr.bf16.gmra.mrb[100].mxu0 %v1679_v33  ;;  %v1681_v24 = vpack.c.bf16 %v4451_v60, %v4429_v12  ;;  %v4541_v54 = vmul.f32 %v1475_v19, %v4465_v22 }
 0x201   : > { %v4544_v43 = vmul.f32 %v1477_v18, %v4480_v1  ;;  %v778_v2 = vadd.f32 %v4952_v13, %v3627_v27  ;;  %v971_v20 = vadd.f32 %v4953_v58, %v3629_v0  ;;  %v1479_v8 = vadd.f32 1.0, %v3110_v45  ;;  %v4955_v45 = vld [vmem:[#allocation34_spill] sm:$0xff] }
 0x202   : > { %v3114_v21 = vpop.eup %3113  ;;  %v1481_v38 = vadd.f32 1.0, %v3112_v31  ;;  %3125 = verf.f32 %v1231_v34  ;;  %2236 = vmatmul.mubr.bf16.gmra.mrb[100].mxu1 %v1681_v24  ;;  %v782_v12 = vadd.f32 %v4227_v63, %v3623_v25  ;;  %v4552_v22 = vmul.f32 0.5, %v774_v61 }
 0x203   : > { %v3116_v60 = vpop.eup %3115  ;;  %3127 = verf.f32 %v1233_v30  ;;  %v1232_v1 = vmul.f32 0.70710677, %v778_v2  ;;  %v975_v39 = vadd.f32 %v4954_v32, %v3625_v26  ;;  %v4557_v29 = vmul.f32 %v1476_v52, %v4495_v59 }
 0x204   : > { %v3118_v56 = vpop.eup %3117  ;;  %v4560_v17 = vmul.f32 %v1478_v37, %v4503_v3  ;;  %v1102_v9 = vmul.f32 0.5, %v967_v7  ;;  %v1234_v19 = vmul.f32 0.70710677, %v971_v20  ;;  %v1480_v14 = vadd.f32 1.0, %v3114_v21 }
 0x205   : > { %v4562_v53 = vmul.f32 0.5, %v776_v50  ;;  %v4564_v63 = vmul.f32 0.5, %v969_v35  ;;  %3129 = verf.f32 %v1232_v1  ;;  %v4567_v61 = vmul.f32 %v1479_v8, %v4505_v55  ;;  %v4956_v35 = vld [vmem:[#allocation35_spill] sm:$0xff] }
 0x206   : > { %v4570_v18 = vmul.f32 %v1481_v38, %v4507_v47  ;;  %v4572_v6 = vmul.f32 0.5, %v778_v2  ;;  %v1235_v59 = vmul.f32 0.70710677, %v782_v12  ;;  %v1482_v3 = vadd.f32 1.0, %v3116_v60 }
 0x207   : > { %v3120_v49 = vpop.eup %3119  ;;  %v1483_v33 = vadd.f32 1.0, %v3118_v56  ;;  %v1237_v7 = vmul.f32 0.70710677, %v975_v39  ;;  %v784_v50 = vadd.f32 %v4955_v45, %v3627_v27  ;;  %3131 = verf.f32 %v1234_v19  ;;  %v4959_v19 = vld [vmem:[#allocation19_spill] sm:$0xff] }
 0x208   : > { %v977_v52 = vadd.f32 %v4956_v35, %v3629_v0  ;;  %v1684_v55 = vpack.c.bf16 %v1600_v10, %v4498_v44  ;;  %v1686_v34 = vpack.c.bf16 %v1602_v16, %v4501_v4  ;;  %v4581_v31 = vmul.f32 %v1480_v14, %v4517_v5  ;;  %v4957_v5 = vld [vmem:[#allocation18_spill] sm:$0xff] }
 0x209   : > { %v3122_v47 = vpop.eup %3121  ;;  %v4583_v37 = vmul.f32 0.5, %v971_v20  ;;  %v4585_v30 = vmul.f32 0.5, %v782_v12  ;;  %v1236_v24 = vmul.f32 0.70710677, %v784_v50  ;;  %v1485_v2 = vadd.f32 1.0, %v3120_v49 }
 0x20a   : > { %v3124_v13 = vpop.eup %3123  ;;  %3133 = verf.f32 %v1235_v59  ;;  %v1238_v58 = vmul.f32 0.70710677, %v977_v52  ;;  %2082 = vmatprep.mubr.bf16.mxu0 %v1684_v55  ;;  %2243 = vmatprep.mubr.bf16.mxu1 %v1686_v34  ;;  %v786_v44 = vadd.f32 %v4249_v28, %v3623_v25  ;;  %v1610_v4 = vmul.f32 %v1482_v3, %v4524_v46  ;;  %v4960_v59 = vld [vmem:[#allocation20_spill] sm:$0xff] }
 0x20b   : > { %3135 = verf.f32 %v1237_v7  ;;  %v979_v10 = vadd.f32 %v4957_v5, %v3625_v26  ;;  %v1683_v16 = vpack.c.bf16 %v4510_v51, %v4478_v23  ;;  %v4595_v21 = vmul.f32 %v1483_v33, %v4526_v40  ;;  %v4958_v51 = vld [vmem:[#allocation36_spill] sm:$0xff]  ;;  %v4962_v5 = vld [vmem:[#allocation38_spill] sm:$0xff] }
 0x20c   : > { %v3126_v20 = vpop.eup %3125  ;;  %v1484_v8 = vadd.f32 1.0, %v3122_v47  ;;  %v4597_v38 = vmul.f32 0.5, %v975_v39  ;;  %3137 = verf.f32 %v1236_v24  ;;  %v1486_v60 = vadd.f32 1.0, %v3124_v13  ;;  %v4961_v13 = vld [vmem:[#allocation37_spill] sm:$0xff] }
 0x20d   : > { %v3128_v12 = vpop.eup %3127  ;;  %3139 = verf.f32 %v1238_v58  ;;  %v1239_v28 = vmul.f32 0.70710677, %v786_v44  ;;  %v1241_v46 = vmul.f32 0.70710677, %v979_v10  ;;  %2083 = vmatmul.mubr.bf16.gmra.mrb[104].mxu0 %v1683_v16  ;;  %v4600_v1 = vmul.f32 %v1485_v2, %v4536_v41 }
 0x20e   : > { %v1685_v23 = vpack.c.bf16 %v4513_v15, %v4493_v48  ;;  %v788_v40 = vadd.f32 %v4958_v51, %v3627_v27  ;;  %v981_v32 = vadd.f32 %v4258_v36, %v3629_v0  ;;  %v1487_v56 = vadd.f32 1.0, %v3126_v20  ;;  %v4963_v51 = vld [vmem:[#allocation39_spill] sm:$0xff] }
 0x20f   : > { %v3130_v39 = vpop.eup %3129  ;;  %3141 = verf.f32 %v1239_v28  ;;  %v792_v14 = vadd.f32 %v4959_v19, %v3623_v25  ;;  %v985_v49 = vadd.f32 %v4960_v59, %v3625_v26  ;;  %v1489_v41 = vadd.f32 1.0, %v3128_v12 }
 0x210   : > { %v4612_v3 = vmul.f32 0.5, %v784_v50  ;;  %3143 = verf.f32 %v1241_v46  ;;  %2244 = vmatmul.mubr.bf16.gmra.mrb[104].mxu1 %v1685_v23  ;;  %v1240_v48 = vmul.f32 0.70710677, %v788_v40  ;;  %v4615_v15 = vmul.f32 %v1484_v8, %v4552_v22 }
 0x211   : > { %v4617_v33 = vmul.f32 %v1486_v60, %v1102_v9  ;;  %v4619_v36 = vmul.f32 0.5, %v977_v52  ;;  %v1242_v7 = vmul.f32 0.70710677, %v981_v32  ;;  %v3132_v45 = vpop.eup %3131  ;;  %v1488_v35 = vadd.f32 1.0, %v3130_v39 }
 0x212   : > { %v4621_v55 = vmul.f32 0.5, %v786_v44  ;;  %3145 = verf.f32 %v1240_v48  ;;  %v1243_v34 = vmul.f32 0.70710677, %v792_v14  ;;  %v4624_v50 = vmul.f32 %v1487_v56, %v4562_v53 }
 0x213   : > { %v4626_v47 = vmul.f32 0.5, %v979_v10  ;;  %3147 = verf.f32 %v1242_v7  ;;  %v1245_v24 = vmul.f32 0.70710677, %v985_v49  ;;  %v4629_v9 = vmul.f32 %v1489_v41, %v4564_v63 }
 0x214   : > { %v3134_v22 = vpop.eup %3133  ;;  %v4631_v52 = vmul.f32 0.5, %v788_v40  ;;  %3149 = verf.f32 %v1243_v34  ;;  %v794_v2 = vadd.f32 %v4961_v13, %v3627_v27  ;;  %v1490_v44 = vadd.f32 1.0, %v3132_v45 }
 0x215   : > { %v3136_v58 = vpop.eup %3135  ;;  %v987_v53 = vadd.f32 %v4962_v5, %v3629_v0  ;;  %v1688_v10 = vpack.c.bf16 %v4581_v31, %v4557_v29  ;;  %v1690_v16 = vpack.c.bf16 %v1610_v4, %v4560_v17  ;;  %v4641_v63 = vmul.f32 %v1488_v35, %v4572_v6  ;;  %v4964_v17 = vld [vmem:[#allocation21_spill] sm:$0xff] }
 0x216   : > { %v3138_v20 = vpop.eup %3137  ;;  %v4643_v8 = vmul.f32 0.5, %v981_v32  ;;  %v4645_v12 = vmul.f32 0.5, %v792_v14  ;;  %v1244_v60 = vmul.f32 0.70710677, %v794_v2  ;;  %v1491_v46 = vadd.f32 1.0, %v3134_v22  ;;  %v4966_v22 = vld [vmem:[#allocation22_spill] sm:$0xff] }
 0x217   : > { %v3140_v28 = vpop.eup %3139  ;;  %3151 = verf.f32 %v1245_v24  ;;  %v1246_v23 = vmul.f32 0.70710677, %v987_v53  ;;  %2090 = vmatprep.mubr.bf16.mxu0 %v1688_v10  ;;  %2251 = vmatprep.mubr.bf16.mxu1 %v1690_v16  ;;  %v796_v29 = vadd.f32 %v4963_v51, %v3623_v25  ;;  %v1493_v31 = vadd.f32 1.0, %v3136_v58 }
 0x218   : > { %3153 = verf.f32 %v1244_v60  ;;  %v989_v6 = vadd.f32 %v4964_v17, %v3625_v26  ;;  %v1687_v4 = vpack.c.bf16 %v4567_v61, %v4541_v54  ;;  %v1618_v32 = vmul.f32 %v1490_v44, %v4583_v37  ;;  %v4965_v54 = vld [vmem:[#allocation40_spill] sm:$0xff] }
 0x219   : > { %v3142_v40 = vpop.eup %3141  ;;  %v4654_v39 = vmul.f32 0.5, %v985_v49  ;;  %3155 = verf.f32 %v1246_v23  ;;  %v1247_v56 = vmul.f32 0.70710677, %v796_v29  ;;  %v1492_v14 = vadd.f32 1.0, %v3138_v20 }
 0x21a   : > { %v3144_v19 = vpop.eup %3143  ;;  %v1494_v59 = vadd.f32 1.0, %v3140_v28  ;;  %v1249_v41 = vmul.f32 0.70710677, %v989_v6  ;;  %2091 = vmatmul.mubr.bf16.gmra.mrb[108].mxu0 %v1687_v4  ;;  %v1689_v48 = vpack.c.bf16 %v4570_v18, %v4544_v43  ;;  %v4659_v7 = vmul.f32 %v1491_v46, %v4585_v30 }
 0x21b   : > { %3157 = verf.f32 %v1247_v56  ;;  %v798_v61 = vadd.f32 %v4965_v54, %v3627_v27  ;;  %v991_v37 = vadd.f32 %v4317_v62, %v3629_v0  ;;  %v4666_v45 = vmul.f32 %v1493_v31, %v4597_v38 }
 0x21c   : > { %v3146_v49 = vpop.eup %3145  ;;  %v1495_v35 = vadd.f32 1.0, %v3142_v40  ;;  %3159 = verf.f32 %v1249_v41  ;;  %2252 = vmatmul.mubr.bf16.gmra.mrb[108].mxu1 %v1689_v48  ;;  %v4670_v43 = vadd.f32 %v4340_v57, %v3623_v25  ;;  %v1497_v30 = vadd.f32 1.0, %v3144_v19 }
 0x21d   : > { %v3148_v18 = vpop.eup %3147  ;;  %v4672_v34 = vmul.f32 0.5, %v794_v2  ;;  %v1248_v24 = vmul.f32 0.70710677, %v798_v61  ;;  %v4676_v13 = vadd.f32 %v4966_v22, %v3625_v26  ;;  %v4679_v38 = vmul.f32 %v1492_v14, %v4612_v3  ;;  %v4968_v14 = vld [vmem:[#allocation24_spill] sm:$0xff] }
 0x21e   : > { %v3150_v62 = vpop.eup %3149  ;;  %v4682_v58 = vmul.f32 %v1494_v59, %v4619_v36  ;;  %v4684_v44 = vmul.f32 0.5, %v987_v53  ;;  %v1250_v57 = vmul.f32 0.70710677, %v991_v37  ;;  %v1496_v5 = vadd.f32 1.0, %v3146_v49 }
 0x21f   : > { %v1498_v10 = vadd.f32 1.0, %v3148_v18  ;;  %v1119_v16 = vmul.f32 0.5, %v796_v29  ;;  %3161 = verf.f32 %v1248_v24  ;;  %v4687_v2 = vmul.f32 %v1495_v35, %v4621_v55  ;;  %v4967_v55 = vld [vmem:[#allocation23_spill] sm:$0xff]  ;;  %v4970_v35 = vld [vmem:[#allocation26_spill] sm:$0xff] }
 0x220   : > { %v1121_v20 = vmul.f32 0.5, %v989_v6  ;;  %3163 = verf.f32 %v1250_v57  ;;  %v1251_v60 = vmul.f32 0.70710677, %v4670_v43  ;;  %v4691_v3 = vmul.f32 %v1497_v30, %v4626_v47 }
 0x221   : > { %v3152_v28 = vpop.eup %3151  ;;  %v1499_v36 = vadd.f32 1.0, %v3150_v62  ;;  %v1253_v53 = vmul.f32 0.70710677, %v4676_v13  ;;  %v4696_v46 = vadd.f32 %v4353_v42, %v3627_v27  ;;  %v1120_v51 = vmul.f32 0.5, %v798_v61 }
 0x222   : > { %v3154_v23 = vpop.eup %3153  ;;  %v4700_v29 = vadd.f32 %v4967_v55, %v3629_v0  ;;  %v1692_v31 = vpack.c.bf16 %v4641_v63, %v4615_v15  ;;  %v1694_v17 = vpack.c.bf16 %v1618_v32, %v4617_v33  ;;  %v1624_v6 = vmul.f32 %v1496_v5, %v4631_v52  ;;  %v4969_v52 = vld [vmem:[#allocation25_spill] sm:$0xff] }
 0x223   : > { %v3156_v47 = vpop.eup %3155  ;;  %v1626_v4 = vmul.f32 %v1498_v10, %v4643_v8  ;;  %v1122_v40 = vmul.f32 0.5, %v991_v37  ;;  %v1252_v42 = vmul.f32 0.70710677, %v4696_v46  ;;  %v1501_v56 = vadd.f32 1.0, %v3152_v28 }
 0x224   : > { %3165 = verf.f32 %v1251_v60  ;;  %v1254_v19 = vmul.f32 0.70710677, %v4700_v29  ;;  %2098 = vmatprep.mubr.bf16.mxu0 %v1692_v31  ;;  %2259 = vmatprep.mubr.bf16.mxu1 %v1694_v17  ;;  %v806_v59 = vadd.f32 %v4968_v14, %v3623_v25  ;;  %v4712_v33 = vmul.f32 %v1499_v36, %v4645_v12 }
 0x225   : > { %v3158_v15 = vpop.eup %3157  ;;  %3167 = verf.f32 %v1253_v53  ;;  %v999_v63 = vadd.f32 %v4969_v52, %v3625_v26  ;;  %v1691_v8 = vpack.c.bf16 %v4624_v50, %v4595_v21  ;;  %v1500_v41 = vadd.f32 1.0, %v3154_v23 }
 0x226   : > { %v3160_v32 = vpop.eup %3159  ;;  %v1502_v48 = vadd.f32 1.0, %v3156_v47  ;;  %v1503_v54 = vadd.f32 1.0, %v3158_v15  ;;  %3169 = verf.f32 %v1252_v42  ;;  %v1255_v37 = vmul.f32 0.70710677, %v806_v59 }
 0x227   : > { %v1505_v61 = vadd.f32 1.0, %v3160_v32  ;;  %3171 = verf.f32 %v1254_v19  ;;  %v1257_v25 = vmul.f32 0.70710677, %v999_v63  ;;  %2099 = vmatmul.mubr.bf16.gmra.mrb[112].mxu0 %v1691_v8  ;;  %v1693_v12 = vpack.c.bf16 %v4629_v9, %v4600_v1 }
 0x228   : > { %v1631_v49 = vmul.f32 %v1503_v54, %v1119_v16  ;;  %v808_v26 = vadd.f32 %v4367_v11, %v3627_v27  ;;  %v1001_v21 = vadd.f32 %v4970_v35, %v3629_v0  ;;  %3173 = verf.f32 %v1255_v37 }
 0x229   : > { %v3162_v50 = vpop.eup %3161  ;;  %v4724_v18 = vmul.f32 %v1505_v61, %v1121_v20  ;;  %v1696_v30 = vpack.c.bf16 %v1624_v6, %v4679_v38  ;;  %v1698_v24 = vpack.c.bf16 %v1626_v4, %v4682_v58  ;;  %v1629_v62 = vmul.f32 %v1501_v56, %v4654_v39  ;;  %2260 = vmatmul.mubr.bf16.gmra.mrb[112].mxu1 %v1693_v12 }
 0x22a   : > { %v3164_v22 = vpop.eup %3163  ;;  %v1504_v57 = vadd.f32 1.0, %v3162_v50  ;;  %3175 = verf.f32 %v1257_v25  ;;  %v1256_v1 = vmul.f32 0.70710677, %v808_v26  ;;  %v1628_v27 = vmul.f32 %v1500_v41, %v4672_v34 }
 0x22b   : > { %v1506_v11 = vadd.f32 1.0, %v3164_v22  ;;  %v1258_v9 = vmul.f32 0.70710677, %v1001_v21  ;;  %2106 = vmatprep.mubr.bf16.mxu0 %v1696_v30  ;;  %2267 = vmatprep.mubr.bf16.mxu1 %v1698_v24  ;;  %v1695_v0 = vpack.c.bf16 %v4687_v2, %v4659_v7  ;;  %v1630_v38 = vmul.f32 %v1502_v48, %v4684_v44 }
 0x22c   : > { %v1632_v5 = vmul.f32 %v1504_v57, %v1120_v51  ;;  %3177 = verf.f32 %v1256_v1  ;;  %v1697_v39 = vpack.c.bf16 %v4691_v3, %v4666_v45  ;;  %v1699_v10 = vpack.c.bf16 %v1631_v49, %v4712_v33 }
 0x22d   : > { %v1634_v58 = vmul.f32 %v1506_v11, %v1122_v40  ;;  %3179 = verf.f32 %v1258_v9  ;;  %v1701_v34 = vpack.c.bf16 %v4724_v18, %v1629_v62  ;;  %v1123_v3 = vmul.f32 0.5, %v4670_v43 }
 0x22e   : > { %v3166_v16 = vpop.eup %3165  ;;  %v1700_v20 = vpack.c.bf16 %v1632_v5, %v1628_v27  ;;  %v1127_v23 = vmul.f32 0.5, %v806_v59  ;;  %v1125_v55 = vmul.f32 0.5, %v4676_v13  ;;  %v1129_v17 = vmul.f32 0.5, %v999_v63 }
 0x22f   : > { %v3168_v60 = vpop.eup %3167  ;;  %2107 = vmatmul.mubr.bf16.gmra.mrb[116].mxu0 %v1695_v0  ;;  %v1702_v28 = vpack.c.bf16 %v1634_v58, %v1630_v38  ;;  %v1507_v44 = vadd.f32 1.0, %v3166_v16  ;;  %v1124_v40 = vmul.f32 0.5, %v4696_v46  ;;  %v1128_v33 = vmul.f32 0.5, %v808_v26 }
 0x230   : > { %v3170_v36 = vpop.eup %3169  ;;  %2114 = vmatprep.mubr.bf16.mxu0 %v1700_v20  ;;  %v1509_v53 = vadd.f32 1.0, %v3168_v60  ;;  %v1126_v43 = vmul.f32 0.5, %v4700_v29  ;;  %v1130_v59 = vmul.f32 0.5, %v1001_v21  ;;  %v4744_v29 = vld [vmem:[%s4868_s4] ss:$0 sm:$0xff] }
 0x231   : > { %v3172_v7 = vpop.eup %3171  ;;  %2268 = vmatmul.mubr.bf16.gmra.mrb[116].mxu1 %v1697_v39  ;;  %v1508_v31 = vadd.f32 1.0, %v3170_v36  ;;  %v1635_v4 = vmul.f32 %v1507_v44, %v1123_v3 }
 0x232   : > { %v3174_v2 = vpop.eup %3173  ;;  %2275 = vmatprep.mubr.bf16.mxu1 %v1702_v28  ;;  %v1510_v42 = vadd.f32 1.0, %v3172_v7  ;;  %v1637_v14 = vmul.f32 %v1509_v53, %v1125_v55 }
 0x233   : > { %v1511_v51 = vadd.f32 1.0, %v3174_v2  ;;  %v1636_v32 = vmul.f32 %v1508_v31, %v1124_v40 }
 0x234   : > { %v3176_v45 = vpop.eup %3175  ;;  %v1638_v48 = vmul.f32 %v1510_v42, %v1126_v43 }
 0x235   : > { %v1513_v47 = vadd.f32 1.0, %v3176_v45  ;;  %v1639_v56 = vmul.f32 %v1511_v51, %v1127_v23 }
 0x236   : > { %v3178_v6 = vpop.eup %3177 }
 0x237   : > { %v3180_v19 = vpop.eup %3179  ;;  %v1641_v15 = vmul.f32 %v1513_v47, %v1129_v17  ;;  %v1512_v52 = vadd.f32 1.0, %v3178_v6  ;;  %2115 = vmatmul.mubr.bf16.gmra.mrb[120].mxu0 %v1699_v10  ;;  %v1703_v13 = vpack.c.bf16 %v1639_v56, %v1635_v4 }
 0x238   : > { %v1514_v8 = vadd.f32 1.0, %v3180_v19 }
 0x239   : > { %v1640_v63 = vmul.f32 %v1512_v52, %v1128_v33  ;;  %v1705_v41 = vpack.c.bf16 %v1641_v15, %v1637_v14  ;;  %2276 = vmatmul.mubr.bf16.gmra.mrb[120].mxu1 %v1701_v34 }
 0x23a   : > { %v1642_v54 = vmul.f32 %v1514_v8, %v1130_v59 }
 0x23b   : > { %v1704_v46 = vpack.c.bf16 %v1640_v63, %v1636_v32 }
 0x23c   : > { %v1706_v61 = vpack.c.bf16 %v1642_v54, %v1638_v48 }
 0x23d   : > { %2122 = vmatprep.mubr.bf16.mxu0 %v1704_v46 }
 0x23e   : > { %2283 = vmatprep.mubr.bf16.mxu1 %v1706_v61 }
 0x23f   : > { %2123 = vmatmul.mubr.bf16.gmra.mrb[124].mxu0 %v1703_v13 }
 0x241   : > { %2284 = vmatmul.mubr.bf16.gmra.mrb[124].mxu1 %v1705_v41 }
 0x25a   : > { %v2547_v37 = vpop.f32.mrb[64].mxu0  ;;  %v2659_v25 = vpop.f32.mrb[64].mxu1 }
 0x25b   : > { %v2548_v49 = vpop.f32.mrb[65].mxu0  ;;  %v2660_v12 = vpop.f32.mrb[65].mxu1 }
 0x25c   : > { %v2549_v26 = vadd.f32 %v2548_v49, %v2547_v37  ;;  %v2661_v35 = vadd.f32 %v2660_v12, %v2659_v25  ;;  %v2550_v21 = vpop.f32.mrb[66].mxu0  ;;  %v2662_v50 = vpop.f32.mrb[66].mxu1 }
 0x25d   : > { %v2551_v18 = vpop.f32.mrb[67].mxu0  ;;  %v2663_v30 = vpop.f32.mrb[67].mxu1 }
 0x25e   : > { %v2005_v24 = vadd.f32 %v2549_v26, %v4744_v29  ;;  %v2552_v22 = vadd.f32 %v2551_v18, %v2550_v21  ;;  %v2664_v62 = vadd.f32 %v2663_v30, %v2662_v50 }
 0x260   : > { %v2166_v57 = vadd.f32 %v2661_v35, %v2005_v24  ;;  %v2008_v1 = vadd.f32 %v2552_v22, %v4744_v29 }
 0x262   : > { %2292 = vst [vmem:[%s4749_s28] sm:$0xff] %v2166_v57  ;;  %v2169_v27 = vadd.f32 %v2664_v62, %v2008_v1 }
 0x264   : > { %2293 = vst [vmem:[%s4749_s28 + $0x8] sm:$0xff] %v2169_v27 }
 0x269   : > { %v2553_v11 = vpop.f32.mrb[68].mxu0 }
 0x26a   : > { %v2554_v0 = vpop.f32.mrb[69].mxu0 }
 0x26b   : > { %v2665_v9 = vpop.f32.mrb[68].mxu1  ;;  %v2555_v5 = vadd.f32 %v2554_v0, %v2553_v11  ;;  %v2556_v58 = vpop.f32.mrb[70].mxu0 }
 0x26c   : > { %v2666_v38 = vpop.f32.mrb[69].mxu1  ;;  %v2557_v34 = vpop.f32.mrb[71].mxu0 }
 0x26d   : > { %v2667_v39 = vadd.f32 %v2666_v38, %v2665_v9  ;;  %v2668_v10 = vpop.f32.mrb[70].mxu1  ;;  %v2013_v20 = vadd.f32 %v2555_v5, %v4744_v29  ;;  %v2558_v60 = vadd.f32 %v2557_v34, %v2556_v58 }
 0x26e   : > { %v2669_v16 = vpop.f32.mrb[71].mxu1 }
 0x26f   : > { %v2670_v28 = vadd.f32 %v2669_v16, %v2668_v10  ;;  %v2174_v36 = vadd.f32 %v2667_v39, %v2013_v20  ;;  %v2016_v7 = vadd.f32 %v2558_v60, %v4744_v29 }
 0x271   : > { %2294 = vst [vmem:[%s4749_s28 + $0x10] sm:$0xff] %v2174_v36  ;;  %v2177_v44 = vadd.f32 %v2670_v28, %v2016_v7 }
 0x273   : > { %2295 = vst [vmem:[%s4749_s28 + $0x18] sm:$0xff] %v2177_v44 }
 0x278   : > { %v2559_v2 = vpop.f32.mrb[72].mxu0  ;;  %v2671_v53 = vpop.f32.mrb[72].mxu1 }
 0x279   : > { %v2560_v45 = vpop.f32.mrb[73].mxu0  ;;  %v2672_v3 = vpop.f32.mrb[73].mxu1 }
 0x27a   : > { %v2561_v23 = vadd.f32 %v2560_v45, %v2559_v2  ;;  %v2673_v51 = vadd.f32 %v2672_v3, %v2671_v53  ;;  %v2562_v55 = vpop.f32.mrb[74].mxu0  ;;  %v2674_v31 = vpop.f32.mrb[74].mxu1 }
 0x27b   : > { %v2563_v17 = vpop.f32.mrb[75].mxu0  ;;  %v2675_v47 = vpop.f32.mrb[75].mxu1 }
 0x27c   : > { %v2021_v6 = vadd.f32 %v2561_v23, %v4744_v29  ;;  %v2564_v4 = vadd.f32 %v2563_v17, %v2562_v55  ;;  %v2676_v40 = vadd.f32 %v2675_v47, %v2674_v31 }
 0x27e   : > { %v2182_v42 = vadd.f32 %v2673_v51, %v2021_v6  ;;  %v2024_v56 = vadd.f32 %v2564_v4, %v4744_v29 }
 0x280   : > { %2296 = vst [vmem:[%s4749_s28 + $0x20] sm:$0xff] %v2182_v42  ;;  %v2185_v19 = vadd.f32 %v2676_v40, %v2024_v56 }
 0x282   : > { %2297 = vst [vmem:[%s4749_s28 + $0x28] sm:$0xff] %v2185_v19 }
 0x283   : > { %v2565_v14 = vpop.f32.mrb[76].mxu0  ;;  %v2677_v15 = vpop.f32.mrb[76].mxu1 }
 0x284   : > { %v2566_v33 = vpop.f32.mrb[77].mxu0  ;;  %v2678_v43 = vpop.f32.mrb[77].mxu1 }
 0x285   : > { %v2567_v52 = vadd.f32 %v2566_v33, %v2565_v14  ;;  %v2568_v59 = vpop.f32.mrb[78].mxu0  ;;  %v2679_v8 = vadd.f32 %v2678_v43, %v2677_v15  ;;  %v2680_v13 = vpop.f32.mrb[78].mxu1 }
 0x286   : > { %v2569_v32 = vpop.f32.mrb[79].mxu0  ;;  %v2681_v48 = vpop.f32.mrb[79].mxu1 }
 0x287   : > { %v2029_v63 = vadd.f32 %v2567_v52, %v4744_v29  ;;  %v2570_v41 = vadd.f32 %v2569_v32, %v2568_v59  ;;  %v2682_v54 = vadd.f32 %v2681_v48, %v2680_v13 }
 0x289   : > { %v2190_v46 = vadd.f32 %v2679_v8, %v2029_v63  ;;  %v2032_v61 = vadd.f32 %v2570_v41, %v4744_v29 }
 0x28b   : > { %2298 = vst [vmem:[%s4749_s28 + $0x30] sm:$0xff] %v2190_v46  ;;  %v2193_v37 = vadd.f32 %v2682_v54, %v2032_v61 }
 0x28d   : > { %2299 = vst [vmem:[%s4749_s28 + $0x38] sm:$0xff] %v2193_v37 }
 0x291   : > { %v2571_v25 = vpop.f32.mrb[80].mxu0 }
 0x292   : > { %v2572_v49 = vpop.f32.mrb[81].mxu0 }
 0x293   : > { %v2573_v12 = vadd.f32 %v2572_v49, %v2571_v25  ;;  %v2574_v26 = vpop.f32.mrb[82].mxu0 }
 0x294   : > { %v2683_v35 = vpop.f32.mrb[80].mxu1  ;;  %v2575_v21 = vpop.f32.mrb[83].mxu0 }
 0x295   : > { %v2037_v50 = vadd.f32 %v2573_v12, %v4744_v29  ;;  %v2684_v18 = vpop.f32.mrb[81].mxu1  ;;  %v2576_v30 = vadd.f32 %v2575_v21, %v2574_v26 }
 0x296   : > { %v2685_v24 = vadd.f32 %v2684_v18, %v2683_v35  ;;  %v2686_v22 = vpop.f32.mrb[82].mxu1 }
 0x297   : > { %v2040_v62 = vadd.f32 %v2576_v30, %v4744_v29  ;;  %v2687_v57 = vpop.f32.mrb[83].mxu1 }
 0x298   : > { %v2198_v1 = vadd.f32 %v2685_v24, %v2037_v50  ;;  %v2688_v27 = vadd.f32 %v2687_v57, %v2686_v22 }
 0x29a   : > { %2300 = vst [vmem:[%s4749_s28 + $0x40] sm:$0xff] %v2198_v1  ;;  %v2201_v11 = vadd.f32 %v2688_v27, %v2040_v62 }
 0x29c   : > { %2301 = vst [vmem:[%s4749_s28 + $0x48] sm:$0xff] %v2201_v11 }
 0x29f   : > { %v2577_v9 = vpop.f32.mrb[84].mxu0 }
 0x2a0   : > { %v2578_v0 = vpop.f32.mrb[85].mxu0  ;;  %v2689_v39 = vpop.f32.mrb[84].mxu1 }
 0x2a1   : > { %v2579_v38 = vadd.f32 %v2578_v0, %v2577_v9  ;;  %v2580_v5 = vpop.f32.mrb[86].mxu0  ;;  %v2690_v34 = vpop.f32.mrb[85].mxu1 }
 0x2a2   : > { %v2581_v58 = vpop.f32.mrb[87].mxu0  ;;  %v2691_v20 = vadd.f32 %v2690_v34, %v2689_v39  ;;  %v2692_v60 = vpop.f32.mrb[86].mxu1 }
 0x2a3   : > { %v2045_v10 = vadd.f32 %v2579_v38, %v4744_v29  ;;  %v2582_v16 = vadd.f32 %v2581_v58, %v2580_v5  ;;  %v2693_v36 = vpop.f32.mrb[87].mxu1 }
 0x2a4   : > { %v2694_v44 = vadd.f32 %v2693_v36, %v2692_v60 }
 0x2a5   : > { %v2048_v28 = vadd.f32 %v2582_v16, %v4744_v29  ;;  %v2206_v7 = vadd.f32 %v2691_v20, %v2045_v10 }
 0x2a7   : > { %2302 = vst [vmem:[%s4749_s28 + $0x50] sm:$0xff] %v2206_v7  ;;  %v2209_v2 = vadd.f32 %v2694_v44, %v2048_v28 }
 0x2a9   : > { %2303 = vst [vmem:[%s4749_s28 + $0x58] sm:$0xff] %v2209_v2 }
 0x2ac   : > { %v2583_v53 = vpop.f32.mrb[88].mxu0 }
 0x2ad   : > { %v2584_v45 = vpop.f32.mrb[89].mxu0 }
 0x2ae   : > { %v2585_v3 = vadd.f32 %v2584_v45, %v2583_v53  ;;  %v2586_v23 = vpop.f32.mrb[90].mxu0 }
 0x2af   : > { %v2695_v51 = vpop.f32.mrb[88].mxu1  ;;  %v2587_v55 = vpop.f32.mrb[91].mxu0 }
 0x2b0   : > { %v2053_v31 = vadd.f32 %v2585_v3, %v4744_v29  ;;  %v2696_v17 = vpop.f32.mrb[89].mxu1  ;;  %v2588_v47 = vadd.f32 %v2587_v55, %v2586_v23 }
 0x2b1   : > { %v2697_v6 = vadd.f32 %v2696_v17, %v2695_v51  ;;  %v2698_v4 = vpop.f32.mrb[90].mxu1 }
 0x2b2   : > { %v2056_v40 = vadd.f32 %v2588_v47, %v4744_v29  ;;  %v2699_v42 = vpop.f32.mrb[91].mxu1 }
 0x2b3   : > { %v2214_v56 = vadd.f32 %v2697_v6, %v2053_v31  ;;  %v2700_v19 = vadd.f32 %v2699_v42, %v2698_v4 }
 0x2b5   : > { %2304 = vst [vmem:[%s4749_s28 + $0x60] sm:$0xff] %v2214_v56  ;;  %v2217_v14 = vadd.f32 %v2700_v19, %v2056_v40 }
 0x2b7   : > { %2305 = vst [vmem:[%s4749_s28 + $0x68] sm:$0xff] %v2217_v14 }
 0x2b9   : > { %v2589_v15 = vpop.f32.mrb[92].mxu0 }
 0x2ba   : > { %v2590_v33 = vpop.f32.mrb[93].mxu0 }
 0x2bb   : > { %v2701_v52 = vpop.f32.mrb[92].mxu1  ;;  %v2591_v43 = vadd.f32 %v2590_v33, %v2589_v15  ;;  %v2592_v59 = vpop.f32.mrb[94].mxu0 }
 0x2bc   : > { %v2702_v8 = vpop.f32.mrb[93].mxu1  ;;  %v2593_v13 = vpop.f32.mrb[95].mxu0 }
 0x2bd   : > { %v2061_v32 = vadd.f32 %v2591_v43, %v4744_v29  ;;  %v2703_v63 = vadd.f32 %v2702_v8, %v2701_v52  ;;  %v2704_v41 = vpop.f32.mrb[94].mxu1  ;;  %v2594_v48 = vadd.f32 %v2593_v13, %v2592_v59 }
 0x2be   : > { %v2705_v54 = vpop.f32.mrb[95].mxu1 }
 0x2bf   : > { %v2222_v46 = vadd.f32 %v2703_v63, %v2061_v32  ;;  %v2064_v61 = vadd.f32 %v2594_v48, %v4744_v29  ;;  %v2706_v37 = vadd.f32 %v2705_v54, %v2704_v41 }
 0x2c1   : > { %2306 = vst [vmem:[%s4749_s28 + $0x70] sm:$0xff] %v2222_v46  ;;  %v2225_v25 = vadd.f32 %v2706_v37, %v2064_v61 }
 0x2c3   : > { %2307 = vst [vmem:[%s4749_s28 + $0x78] sm:$0xff] %v2225_v25 }
 0x2c6   : > { %v2595_v49 = vpop.f32.mrb[96].mxu0 }
 0x2c7   : > { %v2596_v12 = vpop.f32.mrb[97].mxu0 }
 0x2c8   : > { %v2597_v26 = vadd.f32 %v2596_v12, %v2595_v49  ;;  %v2598_v35 = vpop.f32.mrb[98].mxu0 }
 0x2c9   : > { %v2707_v21 = vpop.f32.mrb[96].mxu1  ;;  %v2599_v50 = vpop.f32.mrb[99].mxu0 }
 0x2ca   : > { %v2069_v18 = vadd.f32 %v2597_v26, %v4744_v29  ;;  %v2708_v30 = vpop.f32.mrb[97].mxu1  ;;  %v2600_v24 = vadd.f32 %v2599_v50, %v2598_v35 }
 0x2cb   : > { %v2709_v22 = vadd.f32 %v2708_v30, %v2707_v21  ;;  %v2710_v62 = vpop.f32.mrb[98].mxu1 }
 0x2cc   : > { %v2072_v57 = vadd.f32 %v2600_v24, %v4744_v29  ;;  %v2711_v1 = vpop.f32.mrb[99].mxu1 }
 0x2cd   : > { %v2230_v27 = vadd.f32 %v2709_v22, %v2069_v18  ;;  %v2712_v11 = vadd.f32 %v2711_v1, %v2710_v62 }
 0x2cf   : > { %2308 = vst [vmem:[%s4749_s28 + $0x80] sm:$0xff] %v2230_v27  ;;  %v2233_v9 = vadd.f32 %v2712_v11, %v2072_v57 }
 0x2d1   : > { %2309 = vst [vmem:[%s4749_s28 + $0x88] sm:$0xff] %v2233_v9 }
 0x2d3   : > { %v2601_v0 = vpop.f32.mrb[100].mxu0 }
 0x2d4   : > { %v2602_v38 = vpop.f32.mrb[101].mxu0 }
 0x2d5   : > { %v2713_v5 = vpop.f32.mrb[100].mxu1  ;;  %v2603_v39 = vadd.f32 %v2602_v38, %v2601_v0  ;;  %v2604_v58 = vpop.f32.mrb[102].mxu0 }
 0x2d6   : > { %v2714_v10 = vpop.f32.mrb[101].mxu1  ;;  %v2605_v34 = vpop.f32.mrb[103].mxu0 }
 0x2d7   : > { %v2077_v16 = vadd.f32 %v2603_v39, %v4744_v29  ;;  %v2715_v20 = vadd.f32 %v2714_v10, %v2713_v5  ;;  %v2716_v60 = vpop.f32.mrb[102].mxu1  ;;  %v2606_v28 = vadd.f32 %v2605_v34, %v2604_v58 }
 0x2d8   : > { %v2717_v36 = vpop.f32.mrb[103].mxu1 }
 0x2d9   : > { %v2238_v7 = vadd.f32 %v2715_v20, %v2077_v16  ;;  %v2080_v44 = vadd.f32 %v2606_v28, %v4744_v29  ;;  %v2718_v2 = vadd.f32 %v2717_v36, %v2716_v60 }
 0x2db   : > { %2310 = vst [vmem:[%s4749_s28 + $0x90] sm:$0xff] %v2238_v7  ;;  %v2241_v53 = vadd.f32 %v2718_v2, %v2080_v44 }
 0x2dd   : > { %2311 = vst [vmem:[%s4749_s28 + $0x98] sm:$0xff] %v2241_v53 }
 0x2e0   : > { %v2607_v45 = vpop.f32.mrb[104].mxu0 }
 0x2e1   : > { %v2608_v3 = vpop.f32.mrb[105].mxu0 }
 0x2e2   : > { %v2609_v23 = vadd.f32 %v2608_v3, %v2607_v45  ;;  %v2610_v51 = vpop.f32.mrb[106].mxu0 }
 0x2e3   : > { %v2719_v55 = vpop.f32.mrb[104].mxu1  ;;  %v2611_v31 = vpop.f32.mrb[107].mxu0 }
 0x2e4   : > { %v2085_v17 = vadd.f32 %v2609_v23, %v4744_v29  ;;  %v2720_v47 = vpop.f32.mrb[105].mxu1  ;;  %v2612_v6 = vadd.f32 %v2611_v31, %v2610_v51 }
 0x2e5   : > { %v2721_v4 = vadd.f32 %v2720_v47, %v2719_v55  ;;  %v2722_v40 = vpop.f32.mrb[106].mxu1 }
 0x2e6   : > { %v2088_v42 = vadd.f32 %v2612_v6, %v4744_v29  ;;  %v2723_v56 = vpop.f32.mrb[107].mxu1 }
 0x2e7   : > { %v2246_v19 = vadd.f32 %v2721_v4, %v2085_v17  ;;  %v2724_v14 = vadd.f32 %v2723_v56, %v2722_v40 }
 0x2e9   : > { %2312 = vst [vmem:[%s4749_s28 + $0xa0] sm:$0xff] %v2246_v19  ;;  %v2249_v15 = vadd.f32 %v2724_v14, %v2088_v42 }
 0x2eb   : > { %2313 = vst [vmem:[%s4749_s28 + $0xa8] sm:$0xff] %v2249_v15 }
 0x2ed   : > { %v2613_v33 = vpop.f32.mrb[108].mxu0 }
 0x2ee   : > { %v2614_v52 = vpop.f32.mrb[109].mxu0 }
 0x2ef   : > { %v2725_v43 = vpop.f32.mrb[108].mxu1  ;;  %v2615_v59 = vadd.f32 %v2614_v52, %v2613_v33  ;;  %v2616_v8 = vpop.f32.mrb[110].mxu0 }
 0x2f0   : > { %v2726_v13 = vpop.f32.mrb[109].mxu1  ;;  %v2617_v32 = vpop.f32.mrb[111].mxu0 }
 0x2f1   : > { %v2093_v63 = vadd.f32 %v2615_v59, %v4744_v29  ;;  %v2727_v41 = vadd.f32 %v2726_v13, %v2725_v43  ;;  %v2728_v48 = vpop.f32.mrb[110].mxu1  ;;  %v2618_v54 = vadd.f32 %v2617_v32, %v2616_v8 }
 0x2f2   : > { %v2729_v46 = vpop.f32.mrb[111].mxu1 }
 0x2f3   : > { %v2254_v61 = vadd.f32 %v2727_v41, %v2093_v63  ;;  %v2096_v37 = vadd.f32 %v2618_v54, %v4744_v29  ;;  %v2730_v25 = vadd.f32 %v2729_v46, %v2728_v48 }
 0x2f5   : > { %2314 = vst [vmem:[%s4749_s28 + $0xb0] sm:$0xff] %v2254_v61  ;;  %v2257_v49 = vadd.f32 %v2730_v25, %v2096_v37 }
 0x2f7   : > { %2315 = vst [vmem:[%s4749_s28 + $0xb8] sm:$0xff] %v2257_v49 }
 0x2fa   : > { %v2619_v12 = vpop.f32.mrb[112].mxu0 }
 0x2fb   : > { %v2620_v26 = vpop.f32.mrb[113].mxu0 }
 0x2fc   : > { %v2621_v35 = vadd.f32 %v2620_v26, %v2619_v12  ;;  %v2622_v21 = vpop.f32.mrb[114].mxu0  ;;  %v2731_v50 = vpop.f32.mrb[112].mxu1 }
 0x2fd   : > { %v2623_v18 = vpop.f32.mrb[115].mxu0  ;;  %v2732_v24 = vpop.f32.mrb[113].mxu1 }
 0x2fe   : > { %v2101_v30 = vadd.f32 %v2621_v35, %v4744_v29  ;;  %v2624_v22 = vadd.f32 %v2623_v18, %v2622_v21  ;;  %v2733_v62 = vadd.f32 %v2732_v24, %v2731_v50  ;;  %v2734_v57 = vpop.f32.mrb[114].mxu1 }
 0x2ff   : > { %v2735_v27 = vpop.f32.mrb[115].mxu1 }
 0x300   : > { %v2104_v1 = vadd.f32 %v2624_v22, %v4744_v29  ;;  %v2262_v11 = vadd.f32 %v2733_v62, %v2101_v30  ;;  %v2736_v9 = vadd.f32 %v2735_v27, %v2734_v57 }
 0x302   : > { %v2625_v0 = vpop.f32.mrb[116].mxu0  ;;  %2316 = vst [vmem:[%s4749_s28 + $0xc0] sm:$0xff] %v2262_v11  ;;  %v2265_v38 = vadd.f32 %v2736_v9, %v2104_v1 }
 0x303   : > { %v2626_v5 = vpop.f32.mrb[117].mxu0 }
 0x304   : > { %v2627_v39 = vadd.f32 %v2626_v5, %v2625_v0  ;;  %v2628_v58 = vpop.f32.mrb[118].mxu0  ;;  %2317 = vst [vmem:[%s4749_s28 + $0xc8] sm:$0xff] %v2265_v38  ;;  %v2737_v10 = vpop.f32.mrb[116].mxu1 }
 0x305   : > { %v2629_v34 = vpop.f32.mrb[119].mxu0  ;;  %v2738_v20 = vpop.f32.mrb[117].mxu1 }
 0x306   : > { %v2109_v16 = vadd.f32 %v2627_v39, %v4744_v29  ;;  %v2630_v60 = vadd.f32 %v2629_v34, %v2628_v58  ;;  %v2739_v28 = vadd.f32 %v2738_v20, %v2737_v10  ;;  %v2740_v36 = vpop.f32.mrb[118].mxu1 }
 0x307   : > { %v2741_v44 = vpop.f32.mrb[119].mxu1 }
 0x308   : > { %v2112_v7 = vadd.f32 %v2630_v60, %v4744_v29  ;;  %v2270_v2 = vadd.f32 %v2739_v28, %v2109_v16  ;;  %v2742_v53 = vadd.f32 %v2741_v44, %v2740_v36 }
 0x30a   : > { %v2631_v45 = vpop.f32.mrb[120].mxu0  ;;  %2318 = vst [vmem:[%s4749_s28 + $0xd0] sm:$0xff] %v2270_v2  ;;  %v2273_v3 = vadd.f32 %v2742_v53, %v2112_v7 }
 0x30b   : > { %v2632_v23 = vpop.f32.mrb[121].mxu0 }
 0x30c   : > { %v2633_v51 = vadd.f32 %v2632_v23, %v2631_v45  ;;  %v2634_v55 = vpop.f32.mrb[122].mxu0  ;;  %2319 = vst [vmem:[%s4749_s28 + $0xd8] sm:$0xff] %v2273_v3  ;;  %v2743_v31 = vpop.f32.mrb[120].mxu1 }
 0x30d   : > { %v2635_v17 = vpop.f32.mrb[123].mxu0  ;;  %v2744_v6 = vpop.f32.mrb[121].mxu1 }
 0x30e   : > { %v2117_v47 = vadd.f32 %v2633_v51, %v4744_v29  ;;  %v2636_v4 = vadd.f32 %v2635_v17, %v2634_v55  ;;  %v2745_v40 = vadd.f32 %v2744_v6, %v2743_v31  ;;  %v2746_v42 = vpop.f32.mrb[122].mxu1 }
 0x30f   : > { %v2747_v19 = vpop.f32.mrb[123].mxu1 }
 0x310   : > { %v2120_v56 = vadd.f32 %v2636_v4, %v4744_v29  ;;  %v2278_v14 = vadd.f32 %v2745_v40, %v2117_v47  ;;  %v2748_v15 = vadd.f32 %v2747_v19, %v2746_v42 }
 0x312   : > { %v2637_v33 = vpop.f32.mrb[124].mxu0  ;;  %2320 = vst [vmem:[%s4749_s28 + $0xe0] sm:$0xff] %v2278_v14  ;;  %v2281_v52 = vadd.f32 %v2748_v15, %v2120_v56 }
 0x313   : > { %v2638_v43 = vpop.f32.mrb[125].mxu0 }
 0x314   : > { %v2639_v59 = vadd.f32 %v2638_v43, %v2637_v33  ;;  %v2640_v8 = vpop.f32.mrb[126].mxu0  ;;  %2321 = vst [vmem:[%s4749_s28 + $0xe8] sm:$0xff] %v2281_v52  ;;  %v2749_v13 = vpop.f32.mrb[124].mxu1 }
 0x315   : > { %v2641_v32 = vpop.f32.mrb[127].mxu0  ;;  %v2750_v41 = vpop.f32.mrb[125].mxu1 }
 0x316   : > { %v2125_v63 = vadd.f32 %v2639_v59, %v4744_v29  ;;  %v2642_v48 = vadd.f32 %v2641_v32, %v2640_v8  ;;  %v2751_v54 = vadd.f32 %v2750_v41, %v2749_v13  ;;  %v2752_v46 = vpop.f32.mrb[126].mxu1 }
 0x317   : > { %v2753_v37 = vpop.f32.mrb[127].mxu1 }
 0x318   : > { %v2128_v61 = vadd.f32 %v2642_v48, %v4744_v29  ;;  %v2286_v25 = vadd.f32 %v2751_v54, %v2125_v63  ;;  %v2754_v49 = vadd.f32 %v2753_v37, %v2752_v46 }
 0x31a   : > { %2322 = vst [vmem:[%s4749_s28 + $0xf0] sm:$0xff] %v2286_v25  ;;  %v2289_v12 = vadd.f32 %v2754_v49, %v2128_v61 }
 0x31c   : > { %2323 = vst [vmem:[%s4749_s28 + $0xf8] sm:$0xff] %v2289_v12 }
 0x31d   : > { %3280 = shalt.err (!%p3277_p2)
}
 0x31e   : > { %s3281_s24 = scalar_lea.hbm %s4816_s23, 4096  ;;  %s3285_s13 = scalar_lea.hbm %s4869_s5, 8192 }
 0x31f   : > { %p3282_p13 = scmp.ne.s32.totalorder %s4816_s23, %s3281_s24  ;;  %p3286_p4 = scmp.lt.u32.totalorder %s4816_s23, %s4869_s5 }
 0x320   : > { %p3287_p7 = scmp.lt.u32.totalorder %s3285_s13, %s3281_s24  ;;  %p3289_p11 = scmp.lt.u32.totalorder %s3281_s24, %s4816_s23 }
 0x321   : > { %p3283_p6 = pnand %p3282_p13, %p4971_p0 }
 0x322   : > { %p3288_p8 = por %p3287_p7, %p3286_p4 }
 0x323   : > { %p3284_p10 = pneg %p3283_p6 }
 0x324   : > { %p3290_p1 = por %p3289_p11, %p3288_p8 }
 0x326   : > { %p3291_p3 = pnand %p3290_p1, %p3284_p10 }
 0x328   : > { %3294 = shalt.err (!%p3291_p3)
}
 0x329   : > { %s3348_s14 = smov 128   ;;  %s3349_s30 = smov 8  }
 0x32a   : > { %2765 = dma.vmem_to_hbm [thread:$0]  (%p4971_p0), %s4818_s15, 4096, %s4816_s23, %s2325_s22, %s3348_s14, %s3348_s14, %s3349_s30  }
 0x32b PF: > { %s2353_s11 = sand.u32 1, %s3325_s18   ;;  %p4972_p5 = scmp.ne.s32.totalorder %s4874_s25, 0 }
 0x32c   : > { %p4973_p9 = scmp.ge.s32.totalorder %s3337_s21, 2  ;;  %s2354_s7 = scalar_lea.sflag [#allocation4], %s2353_s11 }
 0x32e   : > { %p2779_p12 = pnand %p4973_p9, %p4972_p5 }
 0x330   : > { %3320 = dma.done.wait (!%p2779_p12), %s2354_s7, 4096  }
 0x331   : > { %3322 = vsyncadd (!%p2779_p12), %s2354_s7, 4294963200  ;;  %p19_p2 = scmp.ge.s32.totalorder %s3493_s16, 4   ;;  %s4974_s18 = smov %s3329_s19 }
 0x332   : > { %s4975_s19 = smov %s3333_s20  ;;  %s4976_s20 = smov %s3502_s27 }
 0x333   : > { %s4977_s21 = smov %s3493_s16  ;;  %21 = sbr.rel (!%p19_p2) target bundleno = 6 (0x6), region = 93 }
 0x33a   :  { %2359 = vsyncpa [#allocation3], 1 }
 0x33b   :  { %2361 = vsyncpa [#allocation3 + $0x1], 1 }
 0x33c   :  { %2362 = vsyncpa [#allocation6], 1 }
 0x33d   :  { %2363 = vsyncpa [#allocation4], 1 }
 0x33e   :  { %2365 = vsyncpa [#allocation4 + $0x1], 1 }

</bundles_post_ra>
